<compile_context>
chip_gen: v5e
topology: v5e:2x2
jax: 0.10.0
libtpu: 0.0.40
codegen_flags: <defaults>
</compile_context>

<pallas_src>
import functools

import jax
import jax.numpy as jnp
from jax import lax
from jax.experimental import pallas as pl
from jax.experimental.pallas import tpu as pltpu


_HIGHEST = lax.Precision.HIGHEST
# dot_general dimension numbers for A @ B^T (contract last dim of both operands)
_TRANS_B_DIMS = (((1,), (1,)), ((), ()))


def _mlp_kernel(x_ref, w1_ref, b1_ref, w2_ref, b2_ref, w3t_ref, b3_ref, o_ref,
                *, cs, nc):
    # Hoist the tiny, VMEM-resident parameters out of the chunk loop.
    w1 = w1_ref[...]
    b1 = b1_ref[...]
    w2 = w2_ref[...]
    b2 = b2_ref[...]
    w3t = w3t_ref[...]
    b3 = b3_ref[...]

    @pl.loop(0, nc)
    def _(c):
        off = pl.multiple_of(c * cs, cs)
        xc = x_ref[pl.ds(off, cs), :]                                # (cs, 53)
        # Layer 1: (cs,53) @ (53,32) + (1,32) -> ReLU
        h1 = jnp.dot(xc, w1, preferred_element_type=jnp.float32,
                     precision=_HIGHEST)
        h1 = jnp.maximum(h1 + b1, 0.0)
        # Layer 2: (cs,32) @ (32,10) + (1,10) -> ReLU
        h2 = jnp.dot(h1, w2, preferred_element_type=jnp.float32,
                     precision=_HIGHEST)
        h2 = jnp.maximum(h2 + b2, 0.0)
        # Layer 3: (1,10) @ (cs,10)^T -> (1,cs)  (lane-dense output slice)
        row = lax.dot_general(w3t, h2, _TRANS_B_DIMS,
                              preferred_element_type=jnp.float32,
                              precision=_HIGHEST)
        o_ref[:, pl.ds(off, cs)] = (row + b3).astype(o_ref.dtype)


def _round_up(n, m):
    return ((n + m - 1) // m) * m


@functools.partial(jax.jit, static_argnames=("tb", "cs"))
def net_forward(x, params, *, tb=8192, cs=1024):
    """x: (B, 53) float32 -> (B,) float32, matching Net.forward semantics."""
    w1, b1, w2, b2, w3t, b3 = params
    B = x.shape[0]

    # --- batch-tile (DMA block) sizing --------------------------------------
    B128 = _round_up(B, 128)
    TB = min(tb, B128)
    # Prefer >=2 grid steps so both v7x TensorCores get work under
    # dimension_semantics=("parallel",).  No-op on single-TC v5e/v6e.
    if -(-B128 // TB) < 2 and B128 >= 256:
        TB = _round_up(-(-B128 // 2), 128)
    B_pad = _round_up(B, TB)
    if B_pad != B:
        x = jnp.pad(x, ((0, B_pad - B), (0, 0)))
    grid = (B_pad // TB,)

    # --- compute-chunk sizing (keeps f32 intermediates ~CS*512 B) -----------
    if TB % cs == 0:
        CS = cs
    elif TB <= 2 * cs:
        CS = TB
    else:
        CS = 128            # 128 always divides TB
    NC = TB // CS

    # Constant index_map -> block is fetched once and stays VMEM-resident.
    def resident(a):
        nd = a.ndim
        return pl.BlockSpec(a.shape, lambda i: (0,) * nd)

    flops = 2 * B_pad * (53 * 32 + 32 * 10 + 10 * 1)
    param_bytes = 4 * (53 * 32 + 32 + 32 * 10 + 10 + 10 + 1)
    bytes_accessed = B_pad * (53 * 4 + 4) + param_bytes

    out = pl.pallas_call(
        functools.partial(_mlp_kernel, cs=CS, nc=NC),
        out_shape=jax.ShapeDtypeStruct((1, B_pad), jnp.float32),
        grid=grid,
        in_specs=[
            pl.BlockSpec((TB, 53), lambda i: (i, 0)),    # x: streamed batch tiles
            resident(w1), resident(b1),
            resident(w2), resident(b2),
            resident(w3t), resident(b3),
        ],
        out_specs=pl.BlockSpec((1, TB), lambda i: (0, i)),
        compiler_params=pltpu.CompilerParams(
            dimension_semantics=("parallel",),           # megacore-shard batch tiles
            # Padded footprint: x lane-pads (TB,53)->(TB,128) = TB*512 B per
            # buffer (double-buffered) + O(CS*512 B) chunk temporaries.
            # 48 MiB covers TB up to ~32K rows and stays under v7x's 64 MiB/TC.
            vmem_limit_bytes=48 * 1024 * 1024,
        ),
        cost_estimate=pl.CostEstimate(
            flops=flops, transcendentals=0, bytes_accessed=bytes_accessed),
    )(x, w1, b1, w2, b2, w3t, b3)

    # (1, B_pad) lane-dense row -> (B,)  (the torch x.squeeze(1))
    return out[0, :B]


def init_params(key):
    """torch.nn.Linear default init: U(-1/sqrt(fan_in), 1/sqrt(fan_in))."""
    layer_shapes = [(53, 32), (32, 10), (10, 1)]
    params = []
    for fan_in, fan_out in layer_shapes:
        key, kw, kb = jax.random.split(key, 3)
        bound = 1.0 / (fan_in ** 0.5)
        w = jax.random.uniform(kw, (fan_in, fan_out), jnp.float32, -bound, bound)
        b = jax.random.uniform(kb, (1, fan_out), jnp.float32, -bound, bound)
        params += [w, b]
    w1, b1, w2, b2, w3, b3 = params
    # Layer-3 weight stored as a (1, 10) row so the kernel emits a lane-dense
    # (1, TB) output via A @ B^T; b3 is (1, 1).
    return (w1, b1, w2, b2, w3.T, b3)


def reference_forward(x, params):
    w1, b1, w2, b2, w3t, b3 = params
    h = jnp.maximum(jnp.dot(x, w1, precision=_HIGHEST) + b1, 0.0)
    h = jnp.maximum(jnp.dot(h, w2, precision=_HIGHEST) + b2, 0.0)
    return (jnp.dot(h, w3t.T, precision=_HIGHEST) + b3)[:, 0]


if __name__ == "__main__":
    key = jax.random.PRNGKey(0)
    key, kx1, kx2 = jax.random.split(key, 3)
    params = init_params(key)

    # Small batch: pads to a single 128-row tile, single compute chunk.
    B1 = 8
    x1 = jax.random.normal(kx1, (B1, 53), jnp.float32)
    y1 = jax.block_until_ready(net_forward(x1, params))
    y1_ref = reference_forward(x1, params)
    assert y1.shape == (B1,)
    assert jnp.allclose(y1, y1_ref, atol=1e-5, rtol=1e-5)

    # Slightly larger batch with small tb/cs to exercise the multi-tile grid
    # (megacore path) and the inner multi-chunk pl.loop.
    B2 = 300
    x2 = jax.random.normal(kx2, (B2, 53), jnp.float32)
    y2 = jax.block_until_ready(net_forward(x2, params, tb=256, cs=128))
    y2_ref = reference_forward(x2, params)
    assert y2.shape == (B2,)
    assert jnp.allclose(y2, y2_ref, atol=1e-5, rtol=1e-5)

    print("KERNEL_OK")
</pallas_src>

<mosaic_0001>
module attributes {stable_mosaic.version = 11 : i64} {
  func.func @_mlp_kernel(%arg0: i32, %arg1: memref<128x53xf32, #tpu.memory_space<vmem>>, %arg2: memref<53x32xf32, #tpu.memory_space<vmem>>, %arg3: memref<1x32xf32, #tpu.memory_space<vmem>>, %arg4: memref<32x10xf32, #tpu.memory_space<vmem>>, %arg5: memref<1x10xf32, #tpu.memory_space<vmem>>, %arg6: memref<1x10xf32, #tpu.memory_space<vmem>>, %arg7: memref<1x1xf32, #tpu.memory_space<vmem>>, %arg8: memref<1x128xf32, #tpu.memory_space<vmem>>) attributes {dimension_semantics = [#tpu.dimension_semantics<parallel>], iteration_bounds = array<i64: 1>, scalar_prefetch = 0 : i64, scratch_operands = 0 : i64, tpu.core_type = #tpu.core_type<tc>, window_params = [{transform_indices = @transform_0, window_bounds = array<i64: 128, 53>}, {pipeline_mode = #tpu.pipeline_mode<synchronous>, transform_indices = @transform_1, window_bounds = array<i64: 53, 32>}, {pipeline_mode = #tpu.pipeline_mode<synchronous>, transform_indices = @transform_2, window_bounds = array<i64: 1, 32>}, {pipeline_mode = #tpu.pipeline_mode<synchronous>, transform_indices = @transform_3, window_bounds = array<i64: 32, 10>}, {pipeline_mode = #tpu.pipeline_mode<synchronous>, transform_indices = @transform_4, window_bounds = array<i64: 1, 10>}, {pipeline_mode = #tpu.pipeline_mode<synchronous>, transform_indices = @transform_5, window_bounds = array<i64: 1, 10>}, {pipeline_mode = #tpu.pipeline_mode<synchronous>, transform_indices = @transform_6, window_bounds = array<i64: 1, 1>}, {transform_indices = @transform_7, window_bounds = array<i64: 1, 128>}]} {
    %c0 = arith.constant 0 : index
    %c0_0 = arith.constant 0 : index
    %0 = vector.load %arg2[%c0, %c0_0] : memref<53x32xf32, #tpu.memory_space<vmem>>, vector<53x32xf32>
    %c0_1 = arith.constant 0 : index
    %c0_2 = arith.constant 0 : index
    %1 = vector.load %arg3[%c0_1, %c0_2] : memref<1x32xf32, #tpu.memory_space<vmem>>, vector<1x32xf32>
    %c0_3 = arith.constant 0 : index
    %c0_4 = arith.constant 0 : index
    %2 = vector.load %arg4[%c0_3, %c0_4] : memref<32x10xf32, #tpu.memory_space<vmem>>, vector<32x10xf32>
    %c0_5 = arith.constant 0 : index
    %c0_6 = arith.constant 0 : index
    %3 = vector.load %arg5[%c0_5, %c0_6] : memref<1x10xf32, #tpu.memory_space<vmem>>, vector<1x10xf32>
    %c0_7 = arith.constant 0 : index
    %c0_8 = arith.constant 0 : index
    %4 = vector.load %arg6[%c0_7, %c0_8] : memref<1x10xf32, #tpu.memory_space<vmem>>, vector<1x10xf32>
    %c0_9 = arith.constant 0 : index
    %c0_10 = arith.constant 0 : index
    %5 = vector.load %arg7[%c0_9, %c0_10] : memref<1x1xf32, #tpu.memory_space<vmem>>, vector<1x1xf32>
    %c0_i32 = arith.constant 0 : i32
    %c1_i32 = arith.constant 1 : i32
    %6 = arith.muli %c0_i32, %c1_i32 : i32
    %c0_i32_11 = arith.constant 0 : i32
    %7 = arith.addi %c0_i32_11, %6 : i32
    %c128_i32 = arith.constant 128 : i32
    %8 = arith.muli %7, %c128_i32 : i32
    %9 = tpu.assume_multiple %8, 128 : i32
    %10 = arith.index_cast %9 : i32 to index
    %c0_12 = arith.constant 0 : index
    %11 = vector.load %arg1[%10, %c0_12] : memref<128x53xf32, #tpu.memory_space<vmem>>, vector<128x53xf32>
    %cst = arith.constant dense<0.000000e+00> : vector<128x32xf32>
    %12 = tpu.matmul %11, %0, %cst {dimension_numbers = #tpu.dot_dimension_numbers<[1], [0], [0], [1], [0, 0, 1, 1], [], []>, precision = #tpu.contract_precision<fp32>} : vector<128x53xf32>, vector<53x32xf32>, vector<128x32xf32> -> vector<128x32xf32>
    %13 = vector.broadcast %1 : vector<1x32xf32> to vector<128x32xf32>
    %14 = arith.addf %12, %13 : vector<128x32xf32>
    %cst_13 = arith.constant 0.000000e+00 : f32
    %15 = vector.broadcast %cst_13 : f32 to vector<128x32xf32>
    %16 = arith.maximumf %14, %15 : vector<128x32xf32>
    %cst_14 = arith.constant dense<0.000000e+00> : vector<128x10xf32>
    %17 = tpu.matmul %16, %2, %cst_14 {dimension_numbers = #tpu.dot_dimension_numbers<[1], [0], [0], [1], [0, 0, 1, 1], [], []>, precision = #tpu.contract_precision<fp32>} : vector<128x32xf32>, vector<32x10xf32>, vector<128x10xf32> -> vector<128x10xf32>
    %18 = vector.broadcast %3 : vector<1x10xf32> to vector<128x10xf32>
    %19 = arith.addf %17, %18 : vector<128x10xf32>
    %cst_15 = arith.constant 0.000000e+00 : f32
    %20 = vector.broadcast %cst_15 : f32 to vector<128x10xf32>
    %21 = arith.maximumf %19, %20 : vector<128x10xf32>
    %cst_16 = arith.constant dense<0.000000e+00> : vector<1x128xf32>
    %22 = tpu.matmul %4, %21, %cst_16 {dimension_numbers = #tpu.dot_dimension_numbers<[1], [1], [0], [0], [0, 0, 1, 0], [], []>, precision = #tpu.contract_precision<fp32>} : vector<1x10xf32>, vector<128x10xf32>, vector<1x128xf32> -> vector<1x128xf32>
    %23 = vector.broadcast %5 : vector<1x1xf32> to vector<1x128xf32>
    %24 = arith.addf %22, %23 : vector<1x128xf32>
    %c0_17 = arith.constant 0 : index
    %25 = arith.index_cast %9 : i32 to index
    %26 = vector.load %arg8[%c0_17, %25] : memref<1x128xf32, #tpu.memory_space<vmem>>, vector<1x128xf32>
    tpu.vector_store %arg8[%c0_17, %25], %24 {strides = array<i32>} : memref<1x128xf32, #tpu.memory_space<vmem>>, vector<1x128xf32>,
    %c1_i32_18 = arith.constant 1 : i32
    return
  }
  func.func @transform_0(%arg0: i32) -> (i32, i32) {
    %c0_i32 = arith.constant 0 : i32
    %c0_i32_0 = arith.constant 0 : i32
    return %arg0, %c0_i32 : i32, i32
  }
  func.func @transform_1(%arg0: i32) -> (i32, i32) {
    %c0_i32 = arith.constant 0 : i32
    %c0_i32_0 = arith.constant 0 : i32
    %c0_i32_1 = arith.constant 0 : i32
    return %c0_i32, %c0_i32_0 : i32, i32
  }
  func.func @transform_2(%arg0: i32) -> (i32, i32) {
    %c0_i32 = arith.constant 0 : i32
    %c0_i32_0 = arith.constant 0 : i32
    %c0_i32_1 = arith.constant 0 : i32
    return %c0_i32, %c0_i32_0 : i32, i32
  }
  func.func @transform_3(%arg0: i32) -> (i32, i32) {
    %c0_i32 = arith.constant 0 : i32
    %c0_i32_0 = arith.constant 0 : i32
    %c0_i32_1 = arith.constant 0 : i32
    return %c0_i32, %c0_i32_0 : i32, i32
  }
  func.func @transform_4(%arg0: i32) -> (i32, i32) {
    %c0_i32 = arith.constant 0 : i32
    %c0_i32_0 = arith.constant 0 : i32
    %c0_i32_1 = arith.constant 0 : i32
    return %c0_i32, %c0_i32_0 : i32, i32
  }
  func.func @transform_5(%arg0: i32) -> (i32, i32) {
    %c0_i32 = arith.constant 0 : i32
    %c0_i32_0 = arith.constant 0 : i32
    %c0_i32_1 = arith.constant 0 : i32
    return %c0_i32, %c0_i32_0 : i32, i32
  }
  func.func @transform_6(%arg0: i32) -> (i32, i32) {
    %c0_i32 = arith.constant 0 : i32
    %c0_i32_0 = arith.constant 0 : i32
    %c0_i32_1 = arith.constant 0 : i32
    return %c0_i32, %c0_i32_0 : i32, i32
  }
  func.func @transform_7(%arg0: i32) -> (i32, i32) {
    %c0_i32 = arith.constant 0 : i32
    %c0_i32_0 = arith.constant 0 : i32
    return %c0_i32, %arg0 : i32, i32
  }
}

</mosaic_0001>

<bundles_post_ra>
// kernel: net_forward.1
= control target key start
LH: loop header
LB: loop body
LE: loop exit
PB: predicated region body
PF: predicated region fallthrough
CT: control target
= control target key end

     0   :  { %vm111_vm0 = vcmask 1044480   ;;  %vm62_vm1 = vcmask 433152   ;;  %vm823_vm2 = vcmask 261120   ;;  %vm1544_vm3 = vcmask 80896   ;;  %s2998_s1 = inlined_call_operand.vmem [shape: f32[53,32], index: 1, kind: input, shape index: {}]   ;;  %s2999_s0 = inlined_call_operand.vmem [shape: f32[128,53], index: 0, kind: input, shape index: {}]   ;;  %s3000_s2 = inlined_call_operand.vmem [shape: f32[1,32], index: 2, kind: input, shape index: {}]   ;;  %s3001_s3 = inlined_call_operand.vmem [shape: f32[32,10], index: 3, kind: input, shape index: {}]   ;;  %s3002_s4 = inlined_call_operand.vmem [shape: f32[1,10], index: 4, kind: input, shape index: {}]   ;;  %s3003_s5 = inlined_call_operand.vmem [shape: f32[1,10], index: 5, kind: input, shape index: {}]   ;;  %s3004_s6 = inlined_call_operand.<no memory space> [shape: f32[1,1], index: 6, kind: input, shape index: {}]   ;;  %s3005_s7 = inlined_call_operand.vmem [shape: f32[1,128], index: 7, kind: output, shape index: {}]  }
   0x1   :  { %v34_v0 = vld [vmem:[%s2998_s1 + $0x30] sm:$0x1f]  ;;  %v33_v1 = vld [vmem:[%s2998_s1 + $0x28] sm:$0xff]  ;;  %v32_v2 = vld [vmem:[%s2998_s1 + $0x20] sm:$0xff] }
   0x2   :  { %v113_v3 = vsel %vm111_vm0, %v34_v0, 0  ;;  %v2010_v4 = vand.u32 4294901760, %v33_v1  ;;  %v2012_v5 = vand.u32 4294901760, %v32_v2  ;;  %v31_v6 = vld [vmem:[%s2998_s1 + $0x18] sm:$0xff]  ;;  %v30_v7 = vld [vmem:[%s2998_s1 + $0x10] sm:$0xff]  ;;  %v29_v8 = vld [vmem:[%s2998_s1 + $0x8] sm:$0xff] }
   0x3   :  { %v2023_v9 = vand.u32 4294901760, %v113_v3  ;;  %v2025_v10 = vand.u32 4294901760, %v31_v6  ;;  %v2027_v11 = vand.u32 4294901760, %v30_v7  ;;  %v2029_v12 = vand.u32 4294901760, %v29_v8  ;;  %v43_v13 = vld [vmem:[%s2999_s0] sm:$0xff]  ;;  %v44_v38 = vld [vmem:[%s2999_s0 + $0x8] sm:$0xff] }
   0x4   :  { %v2035_v14 = vsub.f32 %v33_v1, %v2010_v4  ;;  %v2038_v15 = vsub.f32 %v32_v2, %v2012_v5  ;;  %v64_v16 = vsel %vm62_vm1, %v43_v13, 0  ;;  %v55_v17 = vld [vmem:[%s2999_s0 + $0x60] sm:$0xff]  ;;  %v56_v40 = vld [vmem:[%s2999_s0 + $0x68] sm:$0xff]  ;;  %v45_v45 = vld [vmem:[%s2999_s0 + $0x10] sm:$0xff]  ;;  %v67_v49 = vsel %vm62_vm1, %v44_v38, 0 }
   0x5   :  { %125 = vmatpush.msra.mxu0 %v2023_v9  ;;  %1942 = vmatpush.msra.mxu2 %v2023_v9  ;;  %v2047_v18 = vsub.f32 %v113_v3, %v2023_v9  ;;  %v28_v19 = vld [vmem:[%s2998_s1] sm:$0xff]  ;;  %v2052_v20 = vand.u32 4294901760, %v64_v16  ;;  %v100_v21 = vsel %vm62_vm1, %v55_v17, 0  ;;  %v2056_v22 = vsub.f32 %v31_v6, %v2025_v10  ;;  %v57_v50 = vld [vmem:[%s2999_s0 + $0x70] sm:$0xff]  ;;  %v46_v3 = vld [vmem:[%s2999_s0 + $0x18] sm:$0xff] }
   0x6   :  { %v284_v23 = vand.u32 4294901760, %v2035_v14  ;;  %v290_v24 = vand.u32 4294901760, %v2038_v15  ;;  %v2060_v25 = vand.u32 4294901760, %v100_v21  ;;  %v2063_v26 = vsub.f32 %v30_v7, %v2027_v11  ;;  %v58_v7 = vld [vmem:[%s2999_s0 + $0x78] sm:$0xff] }
   0x7   :  { %127 = vmatpush.msra.mxu0 %v2010_v4  ;;  %1943 = vmatpush.msra.mxu2 %v2010_v4  ;;  %v278_v27 = vand.u32 4294901760, %v2047_v18  ;;  %v2069_v28 = vsub.f32 %v64_v16, %v2052_v20  ;;  %v296_v29 = vand.u32 4294901760, %v2056_v22  ;;  %v2073_v30 = vsub.f32 %v29_v8, %v2029_v12 }
   0x8   :  { %v285_v31 = vsub.f32 %v2035_v14, %v284_v23  ;;  %v2078_v32 = vand.u32 4294901760, %v28_v19  ;;  %v2081_v33 = vsub.f32 %v100_v21, %v2060_v25  ;;  %v291_v35 = vsub.f32 %v2038_v15, %v290_v24 }
   0x9   :  { %129 = vmatpush.msra.mxu0 %v2012_v5  ;;  %1944 = vmatpush.msra.mxu2 %v2012_v5  ;;  %v279_v34 = vsub.f32 %v2047_v18, %v278_v27  ;;  %v140_v36 = vand.u32 4294901760, %v2069_v28  ;;  %v302_v37 = vand.u32 4294901760, %v2063_v26  ;;  %v297_v43 = vsub.f32 %v2056_v22, %v296_v29 }
   0xa   :  { %v236_v39 = vand.u32 4294901760, %v2081_v33  ;;  %v308_v44 = vand.u32 4294901760, %v2073_v30  ;;  %v286_v46 = vand.u32 4294901760, %v285_v31  ;;  %v2116_v48 = vsub.f32 %v28_v19, %v2078_v32 }
   0xb   :  { %131 = vmatpush.msra.mxu0 %v2025_v10  ;;  %1945 = vmatpush.msra.mxu2 %v2025_v10  ;;  %v280_v41 = vand.u32 4294901760, %v279_v34  ;;  %v141_v42 = vsub.f32 %v2069_v28, %v140_v36  ;;  %v292_v51 = vand.u32 4294901760, %v291_v35  ;;  %v303_v52 = vsub.f32 %v2063_v26, %v302_v37 }
   0xc   :  { %v237_v47 = vsub.f32 %v2081_v33, %v236_v39  ;;  %v2127_v53 = vand.u32 4294901760, %v67_v49  ;;  %v103_v54 = vsel %vm62_vm1, %v56_v40, 0  ;;  %v314_v56 = vand.u32 4294901760, %v2116_v48 }
   0xd   :  { %133 = vmatpush.msra.mxu0 %v2027_v11  ;;  %1946 = vmatpush.msra.mxu2 %v2027_v11  ;;  %v142_v55 = vand.u32 4294901760, %v141_v42  ;;  %v2131_v57 = vand.u32 4294901760, %v103_v54  ;;  %v70_v58 = vsel %vm62_vm1, %v45_v45, 0  ;;  %v106_v62 = vsel %vm62_vm1, %v57_v50, 0 }
   0xe   :  { %281 = vmatpush.msra.mxu1 %v280_v41  ;;  %1949 = vmatpush.msra.mxu3 %v280_v41  ;;  %v238_v59 = vand.u32 4294901760, %v237_v47  ;;  %v2137_v60 = vsub.f32 %v67_v49, %v2127_v53  ;;  %v2139_v61 = vand.u32 4294901760, %v70_v58  ;;  %v298_v63 = vand.u32 4294901760, %v297_v43 }
   0xf   :  { %135 = vmatpush.msra.mxu0 %v2029_v12  ;;  %1947 = vmatpush.msra.mxu2 %v2029_v12  ;;  %v309_v0 = vsub.f32 %v2073_v30, %v308_v44  ;;  %v2146_v1 = vsub.f32 %v103_v54, %v2131_v57  ;;  %v2148_v2 = vand.u32 4294901760, %v106_v62  ;;  %v304_v8 = vand.u32 4294901760, %v303_v52 }
  0x10   :  { %287 = vmatpush.msra.mxu1 %v286_v46  ;;  %1950 = vmatpush.msra.mxu3 %v286_v46  ;;  %v148_v6 = vand.u32 4294901760, %v2137_v60  ;;  %v315_v13 = vsub.f32 %v2116_v48, %v314_v56  ;;  %v2164_v17 = vsub.f32 %v70_v58, %v2139_v61  ;;  %v73_v31 = vsel %vm62_vm1, %v46_v3, 0 }
  0x11   :  { %137 = vmatpush.msra.mxu0 %v2078_v32  ;;  %1948 = vmatpush.msra.mxu2 %v2078_v32  ;;  %v244_v16 = vand.u32 4294901760, %v2146_v1  ;;  %v2170_v21 = vsub.f32 %v106_v62, %v2148_v2  ;;  %v310_v34 = vand.u32 4294901760, %v309_v0  ;;  %v109_v38 = vsel %vm62_vm1, %v58_v7, 0  ;;  %v50_v0 = vld [vmem:[%s2999_s0 + $0x38] sm:$0xff] }
  0x12   :  { %293 = vmatpush.msra.mxu1 %v292_v51  ;;  %1951 = vmatpush.msra.mxu3 %v292_v51  ;;  %v149_v19 = vsub.f32 %v2137_v60, %v148_v6  ;;  %v316_v40 = vand.u32 4294901760, %v315_v13  ;;  %v156_v41 = vand.u32 4294901760, %v2164_v17  ;;  %v2181_v42 = vand.u32 4294901760, %v73_v31 }
  0x13   :  { %143 = vmatmul.f32.vlgmr.msra.gmra.mxu0 %v142_v55  ;;  %239 = vmatmul.f32.vlgmr.msra.gmra.mxu2 %v238_v59  ;;  %v245_v35 = vsub.f32 %v2146_v1, %v244_v16  ;;  %v252_v46 = vand.u32 4294901760, %v2170_v21  ;;  %v2185_v47 = vand.u32 4294901760, %v109_v38  ;;  %v51_v55 = vld [vmem:[%s2999_s0 + $0x40] sm:$0xff] }
  0x14   :  { %299 = vmatpush.msra.mxu1 %v298_v63  ;;  %1952 = vmatpush.msra.mxu3 %v298_v63  ;;  %v150_v43 = vand.u32 4294901760, %v149_v19  ;;  %v52_v63 = vld [vmem:[%s2999_s0 + $0x48] sm:$0xff] }
  0x15   :  { %394 = vmatpush.msrb.mxu2 %v2047_v18  ;;  %626 = vmatpush.msrb.mxu0 %v278_v27  ;;  %v246_v45 = vand.u32 4294901760, %v245_v35  ;;  %v47_v18 = vld [vmem:[%s2999_s0 + $0x20] sm:$0xff]  ;;  %v2196_v27 = vsub.f32 %v73_v31, %v2181_v42  ;;  %v2205_v49 = vsub.f32 %v109_v38, %v2185_v47  ;;  %v91_v3 = vsel %vm62_vm1, %v52_v63, 0 }
  0x16   :  { %305 = vmatpush.msra.mxu1 %v304_v8  ;;  %1953 = vmatpush.msra.mxu3 %v304_v8  ;;  %v85_v8 = vsel %vm62_vm1, %v50_v0, 0 }
  0x17   :  { %397 = vmatpush.msrb.mxu2 %v2035_v14  ;;  %630 = vmatpush.msrb.mxu0 %v284_v23  ;;  %v157_v14 = vsub.f32 %v2164_v17, %v156_v41  ;;  %v253_v23 = vsub.f32 %v2170_v21, %v252_v46  ;;  %v164_v52 = vand.u32 4294901760, %v2196_v27  ;;  %v260_v54 = vand.u32 4294901760, %v2205_v49 }
  0x18   :  { %311 = vmatpush.msra.mxu1 %v310_v34  ;;  %1954 = vmatpush.msra.mxu3 %v310_v34  ;;  %v2295_v31 = vand.u32 4294901760, %v85_v8  ;;  %v53_v34 = vld [vmem:[%s2999_s0 + $0x50] sm:$0xff] }
  0x19   :  { %400 = vmatpush.msrb.mxu2 %v2038_v15  ;;  %634 = vmatpush.msrb.mxu0 %v290_v24  ;;  %v76_v15 = vsel %vm62_vm1, %v47_v18, 0  ;;  %v158_v50 = vand.u32 4294901760, %v157_v14  ;;  %v254_v51 = vand.u32 4294901760, %v253_v23  ;;  %v94_v35 = vsel %vm62_vm1, %v53_v34, 0  ;;  %v54_v14 = vld [vmem:[%s2999_s0 + $0x58] sm:$0xff] }
  0x1a   :  { %317 = vmatpush.msra.mxu1 %v316_v40  ;;  %1955 = vmatpush.msra.mxu3 %v316_v40  ;;  %v2212_v24 = vand.u32 4294901760, %v76_v15  ;;  %v195_v40 = vsub.f32 %v85_v8, %v2295_v31  ;;  %v97_v23 = vsel %vm62_vm1, %v54_v14, 0 }
  0x1b   :  { %151 = vmatmul.f32.gmra.mxu0 %v150_v43  ;;  %247 = vmatmul.f32.gmra.mxu2 %v246_v45 }
  0x1c   :  { %319 = vmatmul.f32.vlgmr.msra.gmra.mxu1 %v2052_v20  ;;  %367 = vmatmul.f32.vlgmr.msra.gmra.mxu3 %v2060_v25  ;;  %v196_v45 = vand.u32 4294901760, %v195_v40 }
  0x1d   :  { %403 = vmatpush.msrb.mxu2 %v2056_v22  ;;  %504 = vmatpush.msrb.mxu3 %v2023_v9  ;;  %v261_v22 = vsub.f32 %v2205_v49, %v260_v54 }
  0x1e   :  { %726 = vmatpush.msrb.mxu1 %v2023_v9  ;;  %638 = vmatpush.msrb.mxu0 %v296_v29  ;;  %v48_v9 = vld [vmem:[%s2999_s0 + $0x28] sm:$0xff] }
  0x1f   :  { %406 = vmatpush.msrb.mxu2 %v2063_v26  ;;  %506 = vmatpush.msrb.mxu3 %v2010_v4  ;;  %v2239_v26 = vsub.f32 %v76_v15, %v2212_v24  ;;  %v79_v29 = vsel %vm62_vm1, %v48_v9, 0  ;;  %v197_v15 = vsub.f32 %v195_v40, %v196_v45 }
  0x20   :  { %728 = vmatpush.msrb.mxu1 %v2010_v4  ;;  %642 = vmatpush.msrb.mxu0 %v302_v37  ;;  %v165_v4 = vsub.f32 %v2196_v27, %v164_v52 }
  0x21   :  { %409 = vmatpush.msrb.mxu2 %v2073_v30  ;;  %508 = vmatpush.msrb.mxu3 %v2012_v5  ;;  %v262_v30 = vand.u32 4294901760, %v261_v22  ;;  %v172_v37 = vand.u32 4294901760, %v2239_v26 }
  0x22   :  { %646 = vmatpush.msrb.mxu0 %v308_v44  ;;  %730 = vmatpush.msrb.mxu1 %v2012_v5  ;;  %v166_v5 = vand.u32 4294901760, %v165_v4  ;;  %v2251_v44 = vand.u32 4294901760, %v79_v29 }
  0x23   :  { %159 = vmatmul.f32.gmra.mxu0 %v158_v50  ;;  %255 = vmatmul.f32.gmra.mxu2 %v254_v51  ;;  %v2318_v51 = vand.u32 4294901760, %v91_v3 }
  0x24   :  { %323 = vmatmul.f32.gmra.mxu1 %v2127_v53  ;;  %371 = vmatmul.f32.gmra.mxu3 %v2131_v57  ;;  %v2267_v58 = vsub.f32 %v79_v29, %v2251_v44 }
  0x25   :  { %412 = vmatpush.msrb.mxu2 %v2116_v48  ;;  %510 = vmatpush.msrb.mxu3 %v2025_v10  ;;  %v88_v48 = vsel %vm62_vm1, %v51_v55, 0  ;;  %v211_v4 = vsub.f32 %v91_v3, %v2318_v51 }
  0x26   :  { %650 = vmatpush.msrb.mxu0 %v314_v56  ;;  %732 = vmatpush.msrb.mxu1 %v2025_v10  ;;  %v49_v10 = vld [vmem:[%s2999_s0 + $0x30] sm:$0xff]  ;;  %v173_v56 = vsub.f32 %v2239_v26, %v172_v37  ;;  %v180_v59 = vand.u32 4294901760, %v2267_v58  ;;  %v2307_v18 = vand.u32 4294901760, %v88_v48 }
  0x27   :  { %512 = vmatpush.msrb.mxu3 %v2027_v11  ;;  %v212_v29 = vand.u32 4294901760, %v211_v4 }
  0x28   :  { %734 = vmatpush.msrb.mxu1 %v2027_v11  ;;  %v82_v11 = vsel %vm62_vm1, %v49_v10, 0  ;;  %v203_v50 = vsub.f32 %v88_v48, %v2307_v18  ;;  %v2332_v10 = vand.u32 4294901760, %v97_v23 }
  0x29   :  { %514 = vmatpush.msrb.mxu3 %v2029_v12  ;;  %v2275_v62 = vand.u32 4294901760, %v82_v11 }
  0x2a   :  { %736 = vmatpush.msrb.mxu1 %v2029_v12  ;;  %v174_v12 = vand.u32 4294901760, %v173_v56 }
  0x2b   :  { %167 = vmatmul.f32.gmra.mxu0 %v166_v5  ;;  %263 = vmatmul.f32.gmra.mxu2 %v262_v30  ;;  %v2289_v7 = vsub.f32 %v82_v11, %v2275_v62  ;;  %v2325_v5 = vand.u32 4294901760, %v94_v35 }
  0x2c   :  { %327 = vmatmul.f32.gmra.mxu1 %v2139_v61  ;;  %375 = vmatmul.f32.gmra.mxu3 %v2148_v2 }
  0x2d   :  { %516 = vmatpush.msrb.mxu3 %v2078_v32  ;;  %738 = vmatpush.msrb.mxu1 %v2078_v32  ;;  %v181_v32 = vsub.f32 %v2267_v58, %v180_v59  ;;  %v188_v19 = vand.u32 4294901760, %v2289_v7 }
  0x2f   :  { %v182_v13 = vand.u32 4294901760, %v181_v32  ;;  %v189_v38 = vsub.f32 %v2289_v7, %v188_v19 }
  0x31   :  { %v190_v43 = vand.u32 4294901760, %v189_v38 }
  0x33   :  { %175 = vmatmul.f32.gmra.mxu0 %v174_v12  ;;  %415 = vmatmul.f32.vlgmr.msrb.gmra.mxu2 %v2069_v28  ;;  %v198_v28 = vand.u32 4294901760, %v197_v15 }
  0x34   :  { %331 = vmatmul.f32.gmra.mxu1 %v2181_v42  ;;  %379 = vmatmul.f32.gmra.mxu3 %v2185_v47 }
  0x3b   :  { %183 = vmatmul.f32.gmra.mxu0 %v182_v13  ;;  %420 = vmatmul.f32.gmra.mxu2 %v2137_v60  ;;  %v213_v60 = vsub.f32 %v211_v4, %v212_v29 }
  0x3c   :  { %335 = vmatmul.f32.gmra.mxu1 %v2212_v24  ;;  %520 = vmatmul.f32.vlgmr.msrb.gmra.mxu3 %v140_v36  ;;  %v204_v36 = vand.u32 4294901760, %v203_v50 }
  0x3d   :  { %v214_v30 = vand.u32 4294901760, %v213_v60 }
  0x3e   :  { %v205_v9 = vsub.f32 %v203_v50, %v204_v36 }
  0x40   :  { %v206_v22 = vand.u32 4294901760, %v205_v9 }
  0x43   :  { %191 = vmatmul.f32.gmra.mxu0 %v190_v43  ;;  %425 = vmatmul.f32.gmra.mxu2 %v2164_v17 }
  0x44   :  { %339 = vmatmul.f32.gmra.mxu1 %v2251_v44  ;;  %526 = vmatmul.f32.gmra.mxu3 %v148_v6  ;;  %v219_v6 = vsub.f32 %v94_v35, %v2325_v5 }
  0x46   :  { %v220_v55 = vand.u32 4294901760, %v219_v6 }
  0x48   :  { %v221_v17 = vsub.f32 %v219_v6, %v220_v55 }
  0x4a   :  { %v222_v48 = vand.u32 4294901760, %v221_v17 }
  0x4b   :  { %199 = vmatmul.f32.gmra.mxu0 %v198_v28  ;;  %430 = vmatmul.f32.gmra.mxu2 %v2196_v27  ;;  %v36_v28 = vld [vmem:[%s3001_s3] sm:$0xff] }
  0x4c   :  { %343 = vmatmul.f32.gmra.mxu1 %v2275_v62  ;;  %532 = vmatmul.f32.gmra.mxu3 %v156_v41  ;;  %v227_v41 = vsub.f32 %v97_v23, %v2332_v10  ;;  %v37_v23 = vld [vmem:[%s3001_s3 + $0x8] sm:$0xff] }
  0x4d   :  { %v888_v15 = vand.u32 4294901760, %v37_v23 }
  0x4e   :  { %v228_v56 = vand.u32 4294901760, %v227_v41 }
  0x50   :  { %v229_v27 = vsub.f32 %v227_v41, %v228_v56 }
  0x53   :  { %207 = vmatmul.f32.gmra.mxu0 %v206_v22  ;;  %435 = vmatmul.f32.gmra.mxu2 %v2239_v26 }
  0x54   :  { %347 = vmatmul.f32.gmra.mxu1 %v2295_v31  ;;  %538 = vmatmul.f32.gmra.mxu3 %v164_v52  ;;  %v230_v52 = vand.u32 4294901760, %v229_v27 }
  0x5b   :  { %215 = vmatmul.f32.gmra.mxu0 %v214_v30  ;;  %440 = vmatmul.f32.gmra.mxu2 %v2267_v58 }
  0x5c   :  { %351 = vmatmul.f32.gmra.mxu1 %v2307_v18  ;;  %544 = vmatmul.f32.gmra.mxu3 %v172_v37 }
  0x63   :  { %223 = vmatmul.f32.gmra.mxu0 %v222_v48  ;;  %445 = vmatmul.f32.gmra.mxu2 %v2289_v7 }
  0x64   :  { %355 = vmatmul.f32.gmra.mxu1 %v2318_v51  ;;  %550 = vmatmul.f32.gmra.mxu3 %v180_v59 }
  0x6b   :  { %231 = vmatmul.f32.gmra.mxu0 %v230_v52  ;;  %450 = vmatmul.f32.gmra.mxu2 %v195_v40 }
  0x6c   :  { %359 = vmatmul.f32.gmra.mxu1 %v2325_v5  ;;  %556 = vmatmul.f32.gmra.mxu3 %v188_v19  ;;  %v38_v19 = vld [vmem:[%s3001_s3 + $0x10] sm:$0xff] }
  0x6d   :  { %v886_v34 = vand.u32 4294901760, %v38_v19 }
  0x6f   :  { %v1040_v35 = vsub.f32 %v38_v19, %v886_v34 }
  0x71   :  { %v1041_v38 = vand.u32 4294901760, %v1040_v35 }
  0x73   :  { %455 = vmatmul.f32.gmra.mxu2 %v203_v50  ;;  %652 = vmatmul.f32.vlgmr.msrb.gmra.mxu0 %v2052_v20 }
  0x74   :  { %363 = vmatmul.f32.gmra.mxu1 %v2332_v10  ;;  %562 = vmatmul.f32.gmra.mxu3 %v196_v45  ;;  %v1042_v45 = vsub.f32 %v1040_v35, %v1041_v38 }
  0x76   :  { %v1043_v14 = vand.u32 4294901760, %v1042_v45 }
  0x7b   :  { %460 = vmatmul.f32.gmra.mxu2 %v211_v4  ;;  %656 = vmatmul.f32.gmra.mxu0 %v2127_v53 }
  0x7c   :  { %568 = vmatmul.f32.gmra.mxu3 %v204_v36  ;;  %740 = vmatmul.f32.vlgmr.msrb.gmra.mxu1 %v2052_v20  ;;  %v1046_v36 = vsub.f32 %v37_v23, %v888_v15 }
  0x7e   :  { %v1047_v4 = vand.u32 4294901760, %v1046_v36 }
  0x83   :  { %465 = vmatmul.f32.gmra.mxu2 %v219_v6  ;;  %660 = vmatmul.f32.gmra.mxu0 %v2139_v61 }
  0x84   :  { %574 = vmatmul.f32.gmra.mxu3 %v212_v29  ;;  %744 = vmatmul.f32.gmra.mxu1 %v2127_v53 }
  0x8b   :  { %470 = vmatmul.f32.gmra.mxu2 %v227_v41  ;;  %664 = vmatmul.f32.gmra.mxu0 %v2181_v42 }
  0x8c   :  { %580 = vmatmul.f32.gmra.mxu3 %v220_v55  ;;  %748 = vmatmul.f32.gmra.mxu1 %v2139_v61 }
  0x90   :  { %v2352_v26 = vpop.f32.mrf.mxu0 }
  0x93   :  { %475 = vmatmul.f32.gmra.mxu2 %v2081_v33  ;;  %668 = vmatmul.f32.gmra.mxu0 %v2212_v24  ;;  %v39_v33 = vld [vmem:[%s3001_s3 + $0x18] sm:$0xff] }
  0x94   :  { %586 = vmatmul.f32.gmra.mxu3 %v228_v56  ;;  %752 = vmatmul.f32.gmra.mxu1 %v2181_v42 }
  0x98   :  { %v2357_v20 = vpop.f32.mrf.mxu0 }
  0x99   :  { %v2359_v37 = vpop.f32.mrf.mxu1 }
  0x9b   :  { %480 = vmatmul.f32.gmra.mxu2 %v2146_v1  ;;  %672 = vmatmul.f32.gmra.mxu0 %v2251_v44 }
  0x9c   :  { %592 = vmatmul.f32.gmra.mxu3 %v236_v39  ;;  %756 = vmatmul.f32.gmra.mxu1 %v2212_v24  ;;  %v2382_v39 = vpop.f32.mrf.mxu2  ;;  %v2386_v24 = vand.u32 4294901760, %v39_v33 }
  0x9e   :  { %885 = vmatpush.msra.mxu2 %v2386_v24  ;;  %1240 = vmatpush.msra.mxu1 %v2386_v24 }
  0x9f   :  { %v2391_v1 = vpop.f32.mrf.mxu3 }
  0xa0   :  { %v2366_v53 = vpop.f32.mrf.mxu0  ;;  %887 = vmatpush.msra.mxu2 %v886_v34  ;;  %1242 = vmatpush.msra.mxu1 %v886_v34 }
  0xa1   :  { %v2368_v61 = vpop.f32.mrf.mxu1 }
  0xa2   :  { %1244 = vmatpush.msra.mxu1 %v888_v15  ;;  %889 = vmatpush.msra.mxu2 %v888_v15 }
  0xa3   :  { %485 = vmatmul.f32.gmra.mxu2 %v2170_v21  ;;  %676 = vmatmul.f32.gmra.mxu0 %v2275_v62 }
  0xa4   :  { %598 = vmatmul.f32.gmra.mxu3 %v244_v16  ;;  %760 = vmatmul.f32.gmra.mxu1 %v2251_v44  ;;  %v2395_v16 = vsub.f32 %v39_v33, %v2386_v24  ;;  %v2409_v59 = vpop.f32.mrf.mxu2  ;;  %v2474_v33 = vld [vmem:[%s3000_s2] ss:$0 sm:$0xff] }
  0xa6   :  { %v1035_v44 = vand.u32 4294901760, %v2395_v16  ;;  %1136 = vmatpush.msra.mxu0 %v2395_v16 }
  0xa8   :  { %v2375_v42 = vpop.f32.mrf.mxu0  ;;  %v1036_v21 = vsub.f32 %v2395_v16, %v1035_v44  ;;  %1139 = vmatpush.msra.mxu0 %v1040_v35 }
  0xa9   :  { %v2377_v58 = vpop.f32.mrf.mxu1 }
  0xaa   :  { %1142 = vmatpush.msra.mxu0 %v1046_v36 }
  0xab   :  { %490 = vmatmul.f32.gmra.mxu2 %v2205_v49  ;;  %680 = vmatmul.f32.gmra.mxu0 %v2295_v31 }
  0xac   :  { %604 = vmatmul.f32.gmra.mxu3 %v252_v46  ;;  %764 = vmatmul.f32.gmra.mxu1 %v2275_v62  ;;  %v1037_v46 = vand.u32 4294901760, %v1036_v21  ;;  %v2411_v62 = vpop.f32.mrf.mxu3  ;;  %v2419_v3 = vpop.f32.mrf.mxu2 }
  0xae   :  { %1038 = vmatpush.msra.mxu3 %v1037_v46 }
  0xb0   :  { %v2400_v11 = vpop.f32.mrf.mxu0  ;;  %1044 = vmatpush.msra.mxu3 %v1043_v14 }
  0xb1   :  { %v2402_v12 = vpop.f32.mrf.mxu1 }
  0xb3   :  { %684 = vmatmul.f32.gmra.mxu0 %v2307_v18 }
  0xb4   :  { %610 = vmatmul.f32.gmra.mxu3 %v260_v54  ;;  %768 = vmatmul.f32.gmra.mxu1 %v2295_v31  ;;  %v2423_v49 = vpop.f32.mrf.mxu3  ;;  %v2431_v8 = vpop.f32.mrf.mxu2 }
  0xb8   :  { %v2413_v63 = vpop.f32.mrf.mxu0 }
  0xb9   :  { %v2415_v0 = vpop.f32.mrf.mxu1 }
  0xbb   :  { %688 = vmatmul.f32.gmra.mxu0 %v2318_v51 }
  0xbc   :  { %772 = vmatmul.f32.gmra.mxu1 %v2307_v18  ;;  %v2438_v31 = vpop.f32.mrf.mxu3  ;;  %v416_v18 = vpop.f32.mrf.mxu2 }
  0xc0   :  { %v2421_v32 = vpop.f32.mrf.mxu0 }
  0xc1   :  { %v2425_v54 = vpop.f32.mrf.mxu1 }
  0xc3   :  { %692 = vmatmul.f32.gmra.mxu0 %v2325_v5 }
  0xc4   :  { %776 = vmatmul.f32.gmra.mxu1 %v2318_v51  ;;  %v521_v50 = vpop.f32.mrf.mxu3  ;;  %v890_v51 = vand.u32 4294901760, %v36_v28  ;;  %v421_v55 = vpop.f32.mrf.mxu2 }
  0xc6   :  { %v1052_v22 = vsub.f32 %v36_v28, %v890_v51  ;;  %1246 = vmatpush.msra.mxu1 %v890_v51  ;;  %891 = vmatpush.msra.mxu2 %v890_v51 }
  0xc8   :  { %v2429_v7 = vpop.f32.mrf.mxu0  ;;  %v1053_v60 = vand.u32 4294901760, %v1052_v22  ;;  %1145 = vmatpush.msra.mxu0 %v1052_v22  ;;  %1359 = vmatpush.msrb.mxu2 %v1035_v44 }
  0xc9   :  { %v2433_v13 = vpop.f32.mrf.mxu1 }
  0xca   :  { %v1054_v30 = vsub.f32 %v1052_v22, %v1053_v60  ;;  %1363 = vmatpush.msrb.mxu2 %v1041_v38 }
  0xcb   :  { %696 = vmatmul.f32.gmra.mxu0 %v2332_v10 }
  0xcc   :  { %780 = vmatmul.f32.gmra.mxu1 %v2325_v5  ;;  %v1048_v5 = vsub.f32 %v1046_v36, %v1047_v4  ;;  %1367 = vmatpush.msrb.mxu2 %v1047_v4  ;;  %v527_v17 = vpop.f32.mrf.mxu3 }
  0xce   :  { %v1049_v6 = vand.u32 4294901760, %v1048_v5  ;;  %1371 = vmatpush.msrb.mxu2 %v1053_v60 }
  0xd0   :  { %v2442_v40 = vpop.f32.mrf.mxu0  ;;  %1050 = vmatpush.msra.mxu3 %v1049_v6 }
  0xd1   :  { %v2444_v43 = vpop.f32.mrf.mxu1 }
  0xd3   :  { %700 = vmatmul.f32.gmra.mxu0 %v2060_v25 }
  0xd4   :  { %784 = vmatmul.f32.gmra.mxu1 %v2332_v10  ;;  %v1055_v10 = vand.u32 4294901760, %v1054_v30  ;;  %v533_v27 = vpop.f32.mrf.mxu3 }
  0xd6   :  { %1056 = vmatpush.msra.mxu3 %v1055_v10  ;;  %v169_v10 = vadd.f32 %v2474_v33, %v2375_v42 }
  0xd8   :  { %v2454_v9 = vpop.f32.mrf.mxu0  ;;  %1450 = vmatpush.msrb.mxu3 %v2386_v24 }
  0xd9   :  { %v2456_v29 = vpop.f32.mrf.mxu1 }
  0xda   :  { %1452 = vmatpush.msrb.mxu3 %v886_v34  ;;  %v153_v34 = vadd.f32 %v2474_v33, %v2357_v20 }
  0xdb   :  { %704 = vmatmul.f32.gmra.mxu0 %v2131_v57 }
  0xdc   :  { %788 = vmatmul.f32.gmra.mxu1 %v2060_v25  ;;  %1454 = vmatpush.msrb.mxu3 %v888_v15  ;;  %v426_v25 = vpop.f32.mrf.mxu2  ;;  %v539_v46 = vpop.f32.mrf.mxu3  ;;  %v325_v14 = vadd.f32 %v2368_v61, %v153_v34 }
  0xde   :  { %1456 = vmatpush.msrb.mxu3 %v890_v51  ;;  %v422_v15 = vadd.f32 %v421_v55, %v325_v14 }
  0xe0   :  { %v2460_v41 = vpop.f32.mrf.mxu0 }
  0xe1   :  { %v2462_v48 = vpop.f32.mrf.mxu1 }
  0xe3   :  { %708 = vmatmul.f32.gmra.mxu0 %v2148_v2 }
  0xe4   :  { %792 = vmatmul.f32.gmra.mxu1 %v2131_v57  ;;  %v145_v57 = vadd.f32 %v2474_v33, %v2352_v26  ;;  %v431_v16 = vpop.f32.mrf.mxu2  ;;  %v545_v36 = vpop.f32.mrf.mxu3 }
  0xe6   :  { %v321_v21 = vadd.f32 %v2359_v37, %v145_v57  ;;  %v161_v37 = vadd.f32 %v2474_v33, %v2366_v53 }
  0xe8   :  { %v2467_v56 = vpop.f32.mrf.mxu0  ;;  %v417_v19 = vadd.f32 %v416_v18, %v321_v21  ;;  %v528_v18 = vadd.f32 %v527_v17, %v422_v15  ;;  %v329_v61 = vadd.f32 %v2377_v58, %v161_v37 }
  0xe9   :  { %v2469_v52 = vpop.f32.mrf.mxu1 }
  0xea   :  { %v522_v35 = vadd.f32 %v521_v50, %v417_v19  ;;  %v427_v6 = vadd.f32 %v426_v25, %v329_v61 }
  0xeb   :  { %712 = vmatmul.f32.gmra.mxu0 %v2185_v47 }
  0xec   :  { %796 = vmatmul.f32.gmra.mxu1 %v2148_v2  ;;  %v436_v23 = vpop.f32.mrf.mxu2  ;;  %v534_v17 = vadd.f32 %v533_v27, %v427_v6  ;;  %v185_v6 = vadd.f32 %v2474_v33, %v2413_v63 }
  0xf0   :  { %v653_v24 = vpop.f32.mrf.mxu0 }
  0xf1   :  { %v2480_v44 = vpop.f32.mrf.mxu1  ;;  %v654_v38 = vadd.f32 %v653_v24, %v522_v35  ;;  %v551_v24 = vpop.f32.mrf.mxu3 }
  0xf4   :  { %800 = vmatmul.f32.gmra.mxu1 %v2185_v47  ;;  %v441_v53 = vpop.f32.mrf.mxu2 }
  0xf8   :  { %v657_v45 = vpop.f32.mrf.mxu0 }
  0xf9   :  { %v741_v2 = vpop.f32.mrf.mxu1  ;;  %v658_v20 = vadd.f32 %v657_v45, %v528_v18 }
  0xfa   :  { %v742_v26 = vadd.f32 %v741_v2, %v654_v38  ;;  %v333_v38 = vadd.f32 %v2402_v12, %v169_v10  ;;  %v557_v12 = vpop.f32.mrf.mxu3 }
  0xfc   :  { %v804_v28 = vmax.f32 %v742_v26, 0.0  ;;  %v432_v27 = vadd.f32 %v431_v16, %v333_v38  ;;  %v177_v26 = vadd.f32 %v2474_v33, %v2400_v11  ;;  %v446_v37 = vpop.f32.mrf.mxu2 }
  0xfe   :  { %v825_v47 = vsel %vm823_vm2, %v804_v28, 0  ;;  %v540_v15 = vadd.f32 %v539_v46, %v432_v27 }
  0xff   :  { %v2490_v51 = vand.u32 4294901760, %v825_v47 }
 0x100   :  { %v661_v50 = vpop.f32.mrf.mxu0 }
 0x101   :  { %v893_v4 = vsub.f32 %v825_v47, %v2490_v51  ;;  %v745_v22 = vpop.f32.mrf.mxu1  ;;  %1058 = vmatmul.f32.vlgmr.msra.gmra.mxu3 %v2490_v51  ;;  %v662_v34 = vadd.f32 %v661_v50, %v534_v17 }
 0x102   :  { %v746_v5 = vadd.f32 %v745_v22, %v658_v20  ;;  %v337_v22 = vadd.f32 %v2415_v0, %v177_v26 }
 0x103   :  { %v894_v60 = vand.u32 4294901760, %v893_v4  ;;  %1148 = vmatmul.f32.vlgmr.msra.gmra.mxu0 %v893_v4 }
 0x104   :  { %v805_v30 = vmax.f32 %v746_v5, 0.0  ;;  %v437_v46 = vadd.f32 %v436_v23, %v337_v22 }
 0x105   :  { %1250 = vmatmul.f32.vlgmr.msra.gmra.mxu1 %v894_v60  ;;  %v895_v55 = vsub.f32 %v893_v4, %v894_v60 }
 0x106   :  { %v828_v57 = vsel %vm823_vm2, %v805_v30, 0  ;;  %v546_v30 = vadd.f32 %v545_v36, %v437_v46 }
 0x107   :  { %v2498_v21 = vand.u32 4294901760, %v828_v57  ;;  %v896_v19 = vand.u32 4294901760, %v895_v55 }
 0x108   :  { %v665_v58 = vpop.f32.mrf.mxu0 }
 0x109   :  { %v749_v35 = vpop.f32.mrf.mxu1  ;;  %897 = vmatmul.f32.vlgmr.msra.gmra.mxu2 %v896_v19  ;;  %1062 = vmatmul.f32.gmra.mxu3 %v2498_v21  ;;  %v901_v25 = vsub.f32 %v828_v57, %v2498_v21  ;;  %v666_v20 = vadd.f32 %v665_v58, %v540_v15  ;;  %v341_v58 = vadd.f32 %v2425_v54, %v185_v6 }
 0x10a   :  { %v750_v45 = vadd.f32 %v749_v35, %v662_v34  ;;  %v451_v34 = vpop.f32.mrf.mxu2 }
 0x10b   :  { %1153 = vmatmul.f32.gmra.mxu0 %v901_v25  ;;  %v902_v42 = vand.u32 4294901760, %v901_v25  ;;  %v442_v36 = vadd.f32 %v441_v53, %v341_v58 }
 0x10c   :  { %v806_v2 = vmax.f32 %v750_v45, 0.0 }
 0x10d   :  { %1256 = vmatmul.f32.gmra.mxu1 %v902_v42  ;;  %v903_v14 = vsub.f32 %v901_v25, %v902_v42  ;;  %v563_v25 = vpop.f32.mrf.mxu3  ;;  %v193_v42 = vadd.f32 %v2474_v33, %v2421_v32  ;;  %v552_v27 = vadd.f32 %v551_v24, %v442_v36 }
 0x10e   :  { %v831_v28 = vsel %vm823_vm2, %v806_v2, 0 }
 0x10f   :  { %v2506_v18 = vand.u32 4294901760, %v831_v28  ;;  %v904_v47 = vand.u32 4294901760, %v903_v14 }
 0x110   :  { %v669_v50 = vpop.f32.mrf.mxu0 }
 0x111   :  { %v753_v4 = vpop.f32.mrf.mxu1  ;;  %905 = vmatmul.f32.gmra.mxu2 %v904_v47  ;;  %1066 = vmatmul.f32.gmra.mxu3 %v2506_v18  ;;  %v909_v16 = vsub.f32 %v831_v28, %v2506_v18  ;;  %v670_v57 = vadd.f32 %v669_v50, %v546_v30  ;;  %v345_v47 = vadd.f32 %v2433_v13, %v193_v42 }
 0x112   :  { %v754_v61 = vadd.f32 %v753_v4, %v666_v20  ;;  %v456_v50 = vpop.f32.mrf.mxu2 }
 0x113   :  { %1158 = vmatmul.f32.gmra.mxu0 %v909_v16  ;;  %v910_v11 = vand.u32 4294901760, %v909_v16  ;;  %v447_v24 = vadd.f32 %v446_v37, %v345_v47 }
 0x114   :  { %v807_v5 = vmax.f32 %v754_v61, 0.0  ;;  %v201_v61 = vadd.f32 %v2474_v33, %v2429_v7 }
 0x115   :  { %1262 = vmatmul.f32.gmra.mxu1 %v910_v11  ;;  %v911_v60 = vsub.f32 %v909_v16, %v910_v11  ;;  %v569_v16 = vpop.f32.mrf.mxu3  ;;  %v558_v11 = vadd.f32 %v557_v12, %v447_v24 }
 0x116   :  { %v834_v55 = vsel %vm823_vm2, %v807_v5, 0 }
 0x117   :  { %v2514_v10 = vand.u32 4294901760, %v834_v55  ;;  %v912_v17 = vand.u32 4294901760, %v911_v60 }
 0x118   :  { %v673_v19 = vpop.f32.mrf.mxu0 }
 0x119   :  { %v757_v0 = vpop.f32.mrf.mxu1  ;;  %913 = vmatmul.f32.gmra.mxu2 %v912_v17  ;;  %1070 = vmatmul.f32.gmra.mxu3 %v2514_v10  ;;  %v917_v23 = vsub.f32 %v834_v55, %v2514_v10  ;;  %v674_v15 = vadd.f32 %v673_v19, %v552_v27  ;;  %v349_v55 = vadd.f32 %v2444_v43, %v201_v61 }
 0x11a   :  { %v758_v35 = vadd.f32 %v757_v0, %v670_v57  ;;  %v461_v19 = vpop.f32.mrf.mxu2 }
 0x11b   :  { %1163 = vmatmul.f32.gmra.mxu0 %v917_v23  ;;  %v918_v63 = vand.u32 4294901760, %v917_v23  ;;  %v452_v7 = vadd.f32 %v451_v34, %v349_v55 }
 0x11c   :  { %v808_v38 = vmax.f32 %v758_v35, 0.0 }
 0x11d   :  { %1268 = vmatmul.f32.gmra.mxu1 %v918_v63  ;;  %v919_v45 = vsub.f32 %v917_v23, %v918_v63  ;;  %v209_v23 = vadd.f32 %v2474_v33, %v2442_v40  ;;  %v564_v58 = vadd.f32 %v563_v25, %v452_v7  ;;  %v575_v63 = vpop.f32.mrf.mxu3 }
 0x11e   :  { %v837_v2 = vsel %vm823_vm2, %v808_v38, 0 }
 0x11f   :  { %v2522_v14 = vand.u32 4294901760, %v837_v2  ;;  %v920_v26 = vand.u32 4294901760, %v919_v45  ;;  %v353_v27 = vadd.f32 %v2456_v29, %v209_v23 }
 0x120   :  { %v677_v28 = vpop.f32.mrf.mxu0 }
 0x121   :  { %v761_v54 = vpop.f32.mrf.mxu1  ;;  %921 = vmatmul.f32.gmra.mxu2 %v920_v26  ;;  %1074 = vmatmul.f32.gmra.mxu3 %v2522_v14  ;;  %v925_v53 = vsub.f32 %v837_v2, %v2522_v14  ;;  %v678_v6 = vadd.f32 %v677_v28, %v558_v11  ;;  %v457_v25 = vadd.f32 %v456_v50, %v353_v27 }
 0x122   :  { %v762_v20 = vadd.f32 %v761_v54, %v674_v15  ;;  %v217_v28 = vadd.f32 %v2474_v33, %v2454_v9  ;;  %v466_v47 = vpop.f32.mrf.mxu2 }
 0x123   :  { %1168 = vmatmul.f32.gmra.mxu0 %v925_v53  ;;  %v926_v32 = vand.u32 4294901760, %v925_v53  ;;  %v570_v54 = vadd.f32 %v569_v16, %v457_v25 }
 0x124   :  { %v809_v4 = vmax.f32 %v762_v20, 0.0  ;;  %v357_v61 = vadd.f32 %v2462_v48, %v217_v28 }
 0x125   :  { %1274 = vmatmul.f32.gmra.mxu1 %v926_v32  ;;  %v927_v22 = vsub.f32 %v925_v53, %v926_v32  ;;  %v581_v29 = vpop.f32.mrf.mxu3 }
 0x126   :  { %v840_v46 = vsel %vm823_vm2, %v809_v4, 0  ;;  %v462_v16 = vadd.f32 %v461_v19, %v357_v61 }
 0x127   :  { %v2530_v5 = vand.u32 4294901760, %v840_v46  ;;  %v928_v60 = vand.u32 4294901760, %v927_v22 }
 0x128   :  { %v681_v13 = vpop.f32.mrf.mxu0 }
 0x129   :  { %v765_v30 = vpop.f32.mrf.mxu1  ;;  %929 = vmatmul.f32.gmra.mxu2 %v928_v60  ;;  %1078 = vmatmul.f32.gmra.mxu3 %v2530_v5  ;;  %v933_v37 = vsub.f32 %v840_v46, %v2530_v5  ;;  %v682_v45 = vadd.f32 %v681_v13, %v564_v58  ;;  %v576_v13 = vadd.f32 %v575_v63, %v462_v16 }
 0x12a   :  { %v766_v17 = vadd.f32 %v765_v30, %v678_v6  ;;  %v225_v6 = vadd.f32 %v2474_v33, %v2460_v41  ;;  %v471_v7 = vpop.f32.mrf.mxu2 }
 0x12b   :  { %1173 = vmatmul.f32.gmra.mxu0 %v933_v37  ;;  %v934_v57 = vand.u32 4294901760, %v933_v37 }
 0x12c   :  { %v810_v12 = vmax.f32 %v766_v17, 0.0  ;;  %v361_v19 = vadd.f32 %v2469_v52, %v225_v6 }
 0x12d   :  { %1280 = vmatmul.f32.gmra.mxu1 %v934_v57  ;;  %v935_v0 = vsub.f32 %v933_v37, %v934_v57  ;;  %v587_v23 = vpop.f32.mrf.mxu3 }
 0x12e   :  { %v843_v35 = vsel %vm823_vm2, %v810_v12, 0  ;;  %v467_v58 = vadd.f32 %v466_v47, %v361_v19 }
 0x12f   :  { %v2538_v36 = vand.u32 4294901760, %v843_v35  ;;  %v936_v38 = vand.u32 4294901760, %v935_v0 }
 0x130   :  { %v685_v43 = vpop.f32.mrf.mxu0 }
 0x131   :  { %v769_v42 = vpop.f32.mrf.mxu1  ;;  %937 = vmatmul.f32.gmra.mxu2 %v936_v38  ;;  %1082 = vmatmul.f32.gmra.mxu3 %v2538_v36  ;;  %v941_v34 = vsub.f32 %v843_v35, %v2538_v36  ;;  %v686_v24 = vadd.f32 %v685_v43, %v570_v54  ;;  %v233_v38 = vadd.f32 %v2474_v33, %v2467_v56 }
 0x132   :  { %v770_v2 = vadd.f32 %v769_v42, %v682_v45  ;;  %v582_v45 = vadd.f32 %v581_v29, %v467_v58 }
 0x133   :  { %1178 = vmatmul.f32.gmra.mxu0 %v941_v34  ;;  %v942_v40 = vand.u32 4294901760, %v941_v34  ;;  %v365_v25 = vadd.f32 %v2480_v44, %v233_v38  ;;  %v257_v38 = vadd.f32 %v2474_v33, %v2419_v3 }
 0x134   :  { %v811_v26 = vmax.f32 %v770_v2, 0.0 }
 0x135   :  { %1286 = vmatmul.f32.gmra.mxu1 %v942_v40  ;;  %v943_v15 = vsub.f32 %v941_v34, %v942_v40  ;;  %v472_v28 = vadd.f32 %v471_v7, %v365_v25 }
 0x136   :  { %v846_v53 = vsel %vm823_vm2, %v811_v26, 0 }
 0x137   :  { %v2546_v20 = vand.u32 4294901760, %v846_v53  ;;  %v944_v32 = vand.u32 4294901760, %v943_v15  ;;  %v476_v15 = vpop.f32.mrf.mxu2 }
 0x138   :  { %v689_v4 = vpop.f32.mrf.mxu0 }
 0x139   :  { %v773_v22 = vpop.f32.mrf.mxu1  ;;  %945 = vmatmul.f32.gmra.mxu2 %v944_v32  ;;  %1086 = vmatmul.f32.gmra.mxu3 %v2546_v20  ;;  %v949_v50 = vsub.f32 %v846_v53, %v2546_v20  ;;  %v690_v17 = vadd.f32 %v689_v4, %v576_v13  ;;  %v593_v53 = vpop.f32.mrf.mxu3  ;;  %v241_v32 = vadd.f32 %v2474_v33, %v2382_v39 }
 0x13a   :  { %v774_v11 = vadd.f32 %v773_v22, %v686_v24  ;;  %v588_v24 = vadd.f32 %v587_v23, %v472_v28 }
 0x13b   :  { %1183 = vmatmul.f32.gmra.mxu0 %v949_v50  ;;  %v950_v9 = vand.u32 4294901760, %v949_v50 }
 0x13c   :  { %v812_v46 = vmax.f32 %v774_v11, 0.0 }
 0x13d   :  { %1292 = vmatmul.f32.gmra.mxu1 %v950_v9  ;;  %v951_v60 = vsub.f32 %v949_v50, %v950_v9  ;;  %v369_v9 = vadd.f32 %v2391_v1, %v241_v32 }
 0x13e   :  { %v849_v30 = vsel %vm823_vm2, %v812_v46, 0 }
 0x13f   :  { %v2554_v37 = vand.u32 4294901760, %v849_v30  ;;  %v952_v55 = vand.u32 4294901760, %v951_v60  ;;  %v477_v39 = vadd.f32 %v476_v15, %v369_v9  ;;  %v481_v6 = vpop.f32.mrf.mxu2 }
 0x140   :  { %v693_v57 = vpop.f32.mrf.mxu0 }
 0x141   :  { %v777_v48 = vpop.f32.mrf.mxu1  ;;  %953 = vmatmul.f32.gmra.mxu2 %v952_v55  ;;  %1090 = vmatmul.f32.gmra.mxu3 %v2554_v37  ;;  %v957_v12 = vsub.f32 %v849_v30, %v2554_v37  ;;  %v694_v27 = vadd.f32 %v693_v57, %v582_v45  ;;  %v249_v30 = vadd.f32 %v2474_v33, %v2409_v59  ;;  %v599_v57 = vpop.f32.mrf.mxu3 }
 0x142   :  { %v778_v0 = vadd.f32 %v777_v48, %v690_v17  ;;  %v594_v55 = vadd.f32 %v593_v53, %v477_v39 }
 0x143   :  { %1188 = vmatmul.f32.gmra.mxu0 %v957_v12  ;;  %v958_v41 = vand.u32 4294901760, %v957_v12  ;;  %v373_v23 = vadd.f32 %v2411_v62, %v249_v30 }
 0x144   :  { %v813_v35 = vmax.f32 %v778_v0, 0.0 }
 0x145   :  { %1298 = vmatmul.f32.gmra.mxu1 %v958_v41  ;;  %v959_v63 = vsub.f32 %v957_v12, %v958_v41  ;;  %v482_v58 = vadd.f32 %v481_v6, %v373_v23 }
 0x146   :  { %v852_v43 = vsel %vm823_vm2, %v813_v35, 0 }
 0x147   :  { %v2562_v42 = vand.u32 4294901760, %v852_v43  ;;  %v960_v34 = vand.u32 4294901760, %v959_v63  ;;  %v600_v45 = vadd.f32 %v599_v57, %v482_v58 }
 0x148   :  { %v697_v2 = vpop.f32.mrf.mxu0 }
 0x149   :  { %v781_v52 = vpop.f32.mrf.mxu1  ;;  %961 = vmatmul.f32.gmra.mxu2 %v960_v34  ;;  %1094 = vmatmul.f32.gmra.mxu3 %v2562_v42  ;;  %v965_v40 = vsub.f32 %v852_v43, %v2562_v42  ;;  %v698_v50 = vadd.f32 %v697_v2, %v588_v24  ;;  %v486_v34 = vpop.f32.mrf.mxu2 }
 0x14a   :  { %v782_v26 = vadd.f32 %v781_v52, %v694_v27 }
 0x14b   :  { %1193 = vmatmul.f32.gmra.mxu0 %v965_v40  ;;  %v966_v56 = vand.u32 4294901760, %v965_v40 }
 0x14c   :  { %v814_v54 = vmax.f32 %v782_v26, 0.0  ;;  %v377_v26 = vadd.f32 %v2423_v49, %v257_v38 }
 0x14d   :  { %1304 = vmatmul.f32.gmra.mxu1 %v966_v56  ;;  %v967_v47 = vsub.f32 %v965_v40, %v966_v56  ;;  %v605_v40 = vpop.f32.mrf.mxu3 }
 0x14e   :  { %v855_v4 = vsel %vm823_vm2, %v814_v54, 0  ;;  %v487_v28 = vadd.f32 %v486_v34, %v377_v26 }
 0x14f   :  { %v2570_v29 = vand.u32 4294901760, %v855_v4  ;;  %v968_v22 = vand.u32 4294901760, %v967_v47  ;;  %v265_v47 = vadd.f32 %v2474_v33, %v2431_v8 }
 0x150   :  { %v701_v44 = vpop.f32.mrf.mxu0  ;;  %v606_v32 = vadd.f32 %v605_v40, %v487_v28 }
 0x151   :  { %v785_v61 = vpop.f32.mrf.mxu1  ;;  %969 = vmatmul.f32.gmra.mxu2 %v968_v22  ;;  %1098 = vmatmul.f32.gmra.mxu3 %v2570_v29  ;;  %v973_v11 = vsub.f32 %v855_v4, %v2570_v29  ;;  %v702_v12 = vadd.f32 %v701_v44, %v594_v55  ;;  %v491_v44 = vpop.f32.mrf.mxu2 }
 0x152   :  { %v786_v16 = vadd.f32 %v785_v61, %v698_v50 }
 0x153   :  { %1198 = vmatmul.f32.gmra.mxu0 %v973_v11  ;;  %v974_v46 = vand.u32 4294901760, %v973_v11 }
 0x154   :  { %v815_v60 = vmax.f32 %v786_v16, 0.0 }
 0x155   :  { %1310 = vmatmul.f32.gmra.mxu1 %v974_v46  ;;  %v975_v13 = vsub.f32 %v973_v11, %v974_v46  ;;  %v381_v11 = vadd.f32 %v2438_v31, %v265_v47  ;;  %v611_v16 = vpop.f32.mrf.mxu3 }
 0x156   :  { %v858_v17 = vsel %vm823_vm2, %v815_v60, 0 }
 0x157   :  { %v2578_v7 = vand.u32 4294901760, %v858_v17  ;;  %v976_v48 = vand.u32 4294901760, %v975_v13  ;;  %v492_v33 = vadd.f32 %v491_v44, %v381_v11 }
 0x158   :  { %v705_v1 = vpop.f32.mrf.mxu0 }
 0x159   :  { %v789_v19 = vpop.f32.mrf.mxu1  ;;  %977 = vmatmul.f32.gmra.mxu2 %v976_v48  ;;  %1102 = vmatmul.f32.gmra.mxu3 %v2578_v7  ;;  %v981_v0 = vsub.f32 %v858_v17, %v2578_v7  ;;  %v706_v52 = vadd.f32 %v705_v1, %v600_v45  ;;  %v612_v6 = vadd.f32 %v611_v16, %v492_v33 }
 0x15a   :  { %v790_v41 = vadd.f32 %v789_v19, %v702_v12 }
 0x15b   :  { %1203 = vmatmul.f32.gmra.mxu0 %v981_v0  ;;  %v982_v59 = vand.u32 4294901760, %v981_v0 }
 0x15c   :  { %v816_v35 = vmax.f32 %v790_v41, 0.0 }
 0x15d   :  { %1316 = vmatmul.f32.gmra.mxu1 %v982_v59  ;;  %v983_v63 = vsub.f32 %v981_v0, %v982_v59 }
 0x15e   :  { %v861_v43 = vsel %vm823_vm2, %v816_v35, 0 }
 0x15f   :  { %v2586_v27 = vand.u32 4294901760, %v861_v43  ;;  %v984_v2 = vand.u32 4294901760, %v983_v63 }
 0x160   :  { %v709_v56 = vpop.f32.mrf.mxu0 }
 0x161   :  { %v793_v62 = vpop.f32.mrf.mxu1  ;;  %985 = vmatmul.f32.gmra.mxu2 %v984_v2  ;;  %1106 = vmatmul.f32.gmra.mxu3 %v2586_v27  ;;  %v989_v25 = vsub.f32 %v861_v43, %v2586_v27  ;;  %v710_v50 = vadd.f32 %v709_v56, %v606_v32  ;;  %v2615_v2 = vld [vmem:[%s3002_s4] ss:$0 sm:$0xff] }
 0x162   :  { %v794_v15 = vadd.f32 %v793_v62, %v706_v52 }
 0x163   :  { %1208 = vmatmul.f32.gmra.mxu0 %v989_v25  ;;  %v990_v3 = vand.u32 4294901760, %v989_v25 }
 0x164   :  { %v817_v54 = vmax.f32 %v794_v15, 0.0 }
 0x165   :  { %1322 = vmatmul.f32.gmra.mxu1 %v990_v3  ;;  %v991_v53 = vsub.f32 %v989_v25, %v990_v3 }
 0x166   :  { %v864_v24 = vsel %vm823_vm2, %v817_v54, 0 }
 0x167   :  { %v2594_v4 = vand.u32 4294901760, %v864_v24  ;;  %v992_v22 = vand.u32 4294901760, %v991_v53 }
 0x168   :  { %v713_v39 = vpop.f32.mrf.mxu0 }
 0x169   :  { %v797_v49 = vpop.f32.mrf.mxu1  ;;  %993 = vmatmul.f32.gmra.mxu2 %v992_v22  ;;  %1110 = vmatmul.f32.gmra.mxu3 %v2594_v4  ;;  %v997_v61 = vsub.f32 %v864_v24, %v2594_v4  ;;  %v714_v17 = vadd.f32 %v713_v39, %v612_v6 }
 0x16a   :  { %v798_v9 = vadd.f32 %v797_v49, %v710_v50 }
 0x16b   :  { %1213 = vmatmul.f32.gmra.mxu0 %v997_v61  ;;  %v998_v8 = vand.u32 4294901760, %v997_v61 }
 0x16c   :  { %v818_v46 = vmax.f32 %v798_v9, 0.0 }
 0x16d   :  { %1328 = vmatmul.f32.gmra.mxu1 %v998_v8  ;;  %v999_v60 = vsub.f32 %v997_v61, %v998_v8 }
 0x16e   :  { %v867_v13 = vsel %vm823_vm2, %v818_v46, 0 }
 0x16f   :  { %v2600_v30 = vand.u32 4294901760, %v867_v13  ;;  %v1000_v55 = vand.u32 4294901760, %v999_v60 }
 0x171   :  { %v801_v57 = vpop.f32.mrf.mxu1  ;;  %1001 = vmatmul.f32.gmra.mxu2 %v1000_v55  ;;  %1114 = vmatmul.f32.gmra.mxu3 %v2600_v30  ;;  %v1005_v31 = vsub.f32 %v867_v13, %v2600_v30 }
 0x172   :  { %v802_v48 = vadd.f32 %v801_v57, %v714_v17 }
 0x173   :  { %1218 = vmatmul.f32.gmra.mxu0 %v1005_v31  ;;  %v1006_v12 = vand.u32 4294901760, %v1005_v31 }
 0x174   :  { %v819_v1 = vmax.f32 %v802_v48, 0.0 }
 0x175   :  { %1334 = vmatmul.f32.gmra.mxu1 %v1006_v12  ;;  %v1007_v19 = vsub.f32 %v1005_v31, %v1006_v12 }
 0x176   :  { %v870_v0 = vsel %vm823_vm2, %v819_v1, 0 }
 0x177   :  { %v2605_v23 = vand.u32 4294901760, %v870_v0  ;;  %v1008_v41 = vand.u32 4294901760, %v1007_v19 }
 0x179   :  { %1009 = vmatmul.f32.gmra.mxu2 %v1008_v41  ;;  %1118 = vmatmul.f32.gmra.mxu3 %v2605_v23  ;;  %v1013_v59 = vsub.f32 %v870_v0, %v2605_v23 }
 0x17b   :  { %1223 = vmatmul.f32.gmra.mxu0 %v1013_v59  ;;  %v1014_v58 = vand.u32 4294901760, %v1013_v59 }
 0x17d   :  { %1340 = vmatmul.f32.gmra.mxu1 %v1014_v58  ;;  %v1015_v35 = vsub.f32 %v1013_v59, %v1014_v58 }
 0x17f   :  { %v1016_v63 = vand.u32 4294901760, %v1015_v35 }
 0x180   :  { %v1149_v38 = vpop.f32.mrf.mxu0 }
 0x181   :  { %1017 = vmatmul.f32.gmra.mxu2 %v1016_v63  ;;  %1458 = vmatmul.f32.vlgmr.msrb.gmra.mxu3 %v2490_v51 }
 0x182   :  { %v1251_v45 = vpop.f32.mrf.mxu1 }
 0x184   :  { %v1059_v43 = vpop.f32.mrf.mxu3 }
 0x188   :  { %v1154_v34 = vpop.f32.mrf.mxu0 }
 0x189   :  { %1373 = vmatmul.f32.vlgmr.msrb.gmra.mxu2 %v2490_v51  ;;  %1462 = vmatmul.f32.gmra.mxu3 %v2498_v21 }
 0x18a   :  { %v1257_v52 = vpop.f32.mrf.mxu1 }
 0x18c   :  { %v898_v40 = vpop.f32.mrf.mxu2  ;;  %v1063_v62 = vpop.f32.mrf.mxu3 }
 0x18d   :  { %v899_v25 = vadd.f32 %v2615_v2, %v898_v40 }
 0x18f   :  { %v1060_v26 = vadd.f32 %v1059_v43, %v899_v25 }
 0x190   :  { %v1159_v15 = vpop.f32.mrf.mxu0 }
 0x191   :  { %1377 = vmatmul.f32.gmra.mxu2 %v2498_v21  ;;  %1466 = vmatmul.f32.gmra.mxu3 %v2506_v18  ;;  %v1150_v56 = vadd.f32 %v1149_v38, %v1060_v26 }
 0x192   :  { %v1263_v51 = vpop.f32.mrf.mxu1 }
 0x193   :  { %v2620_v3 = vadd.f32 %v1251_v45, %v1150_v56 }
 0x194   :  { %v906_v28 = vpop.f32.mrf.mxu2  ;;  %v1067_v54 = vpop.f32.mrf.mxu3 }
 0x195   :  { %v907_v53 = vadd.f32 %v2615_v2, %v906_v28 }
 0x197   :  { %v1064_v47 = vadd.f32 %v1063_v62, %v907_v53 }
 0x198   :  { %v1164_v24 = vpop.f32.mrf.mxu0 }
 0x199   :  { %1381 = vmatmul.f32.gmra.mxu2 %v2506_v18  ;;  %1470 = vmatmul.f32.gmra.mxu3 %v2514_v10  ;;  %v1155_v32 = vadd.f32 %v1154_v34, %v1064_v47 }
 0x19a   :  { %v1269_v44 = vpop.f32.mrf.mxu1 }
 0x19b   :  { %v2625_v22 = vadd.f32 %v1257_v52, %v1155_v32 }
 0x19c   :  { %v914_v21 = vpop.f32.mrf.mxu2  ;;  %v1071_v50 = vpop.f32.mrf.mxu3 }
 0x19d   :  { %v915_v49 = vadd.f32 %v2615_v2, %v914_v21 }
 0x19f   :  { %v1068_v61 = vadd.f32 %v1067_v54, %v915_v49 }
 0x1a0   :  { %v1169_v8 = vpop.f32.mrf.mxu0 }
 0x1a1   :  { %1385 = vmatmul.f32.gmra.mxu2 %v2514_v10  ;;  %1474 = vmatmul.f32.gmra.mxu3 %v2522_v14  ;;  %v1160_v11 = vadd.f32 %v1159_v15, %v1068_v61 }
 0x1a2   :  { %v1275_v46 = vpop.f32.mrf.mxu1 }
 0x1a3   :  { %v2630_v9 = vadd.f32 %v1263_v51, %v1160_v11 }
 0x1a4   :  { %v922_v18 = vpop.f32.mrf.mxu2  ;;  %v1075_v16 = vpop.f32.mrf.mxu3 }
 0x1a5   :  { %v923_v33 = vadd.f32 %v2615_v2, %v922_v18 }
 0x1a7   :  { %v1072_v39 = vadd.f32 %v1071_v50, %v923_v33 }
 0x1a8   :  { %v1174_v17 = vpop.f32.mrf.mxu0 }
 0x1a9   :  { %1389 = vmatmul.f32.gmra.mxu2 %v2522_v14  ;;  %1478 = vmatmul.f32.gmra.mxu3 %v2530_v5  ;;  %v1165_v60 = vadd.f32 %v1164_v24, %v1072_v39 }
 0x1aa   :  { %v1281_v31 = vpop.f32.mrf.mxu1 }
 0x1ab   :  { %v2635_v6 = vadd.f32 %v1269_v44, %v1165_v60 }
 0x1ac   :  { %v930_v10 = vpop.f32.mrf.mxu2  ;;  %v1079_v13 = vpop.f32.mrf.mxu3 }
 0x1ad   :  { %v931_v55 = vadd.f32 %v2615_v2, %v930_v10 }
 0x1af   :  { %v1076_v57 = vadd.f32 %v1075_v16, %v931_v55 }
 0x1b0   :  { %v1179_v41 = vpop.f32.mrf.mxu0 }
 0x1b1   :  { %1393 = vmatmul.f32.gmra.mxu2 %v2530_v5  ;;  %1482 = vmatmul.f32.gmra.mxu3 %v2538_v36  ;;  %v1170_v48 = vadd.f32 %v1169_v8, %v1076_v57 }
 0x1b2   :  { %v1287_v58 = vpop.f32.mrf.mxu1 }
 0x1b3   :  { %v2640_v12 = vadd.f32 %v1275_v46, %v1170_v48 }
 0x1b4   :  { %v938_v14 = vpop.f32.mrf.mxu2  ;;  %v1083_v1 = vpop.f32.mrf.mxu3 }
 0x1b5   :  { %v939_v19 = vadd.f32 %v2615_v2, %v938_v14 }
 0x1b7   :  { %v1080_v0 = vadd.f32 %v1079_v13, %v939_v19 }
 0x1b8   :  { %v1184_v34 = vpop.f32.mrf.mxu0 }
 0x1b9   :  { %1397 = vmatmul.f32.gmra.mxu2 %v2538_v36  ;;  %1486 = vmatmul.f32.gmra.mxu3 %v2546_v20  ;;  %v1175_v59 = vadd.f32 %v1174_v17, %v1080_v0 }
 0x1ba   :  { %v1293_v25 = vpop.f32.mrf.mxu1 }
 0x1bb   :  { %v2645_v35 = vadd.f32 %v1281_v31, %v1175_v59 }
 0x1bc   :  { %v946_v5 = vpop.f32.mrf.mxu2  ;;  %v1087_v63 = vpop.f32.mrf.mxu3 }
 0x1bd   :  { %v947_v38 = vadd.f32 %v2615_v2, %v946_v5 }
 0x1bf   :  { %v1084_v45 = vadd.f32 %v1083_v1, %v947_v38 }
 0x1c0   :  { %v1189_v54 = vpop.f32.mrf.mxu0 }
 0x1c1   :  { %1401 = vmatmul.f32.gmra.mxu2 %v2546_v20  ;;  %1490 = vmatmul.f32.gmra.mxu3 %v2554_v37  ;;  %v1180_v43 = vadd.f32 %v1179_v41, %v1084_v45 }
 0x1c2   :  { %v1299_v47 = vpop.f32.mrf.mxu1 }
 0x1c3   :  { %v2650_v52 = vadd.f32 %v1287_v58, %v1180_v43 }
 0x1c4   :  { %v954_v36 = vpop.f32.mrf.mxu2  ;;  %v1091_v40 = vpop.f32.mrf.mxu3 }
 0x1c5   :  { %v955_v62 = vadd.f32 %v2615_v2, %v954_v36 }
 0x1c7   :  { %v1088_v26 = vadd.f32 %v1087_v63, %v955_v62 }
 0x1c8   :  { %v1194_v49 = vpop.f32.mrf.mxu0 }
 0x1c9   :  { %1405 = vmatmul.f32.gmra.mxu2 %v2554_v37  ;;  %1494 = vmatmul.f32.gmra.mxu3 %v2562_v42  ;;  %v1185_v15 = vadd.f32 %v1184_v34, %v1088_v26 }
 0x1ca   :  { %v1305_v11 = vpop.f32.mrf.mxu1 }
 0x1cb   :  { %v2655_v56 = vadd.f32 %v1293_v25, %v1185_v15 }
 0x1cc   :  { %v962_v20 = vpop.f32.mrf.mxu2  ;;  %v1095_v51 = vpop.f32.mrf.mxu3 }
 0x1cd   :  { %v963_v28 = vadd.f32 %v2615_v2, %v962_v20 }
 0x1cf   :  { %v1092_v53 = vadd.f32 %v1091_v40, %v963_v28 }
 0x1d1   :  { %1409 = vmatmul.f32.gmra.mxu2 %v2562_v42  ;;  %1498 = vmatmul.f32.gmra.mxu3 %v2570_v29  ;;  %v1190_v32 = vadd.f32 %v1189_v54, %v1092_v53 }
 0x1d3   :  { %v2660_v24 = vadd.f32 %v1299_v47, %v1190_v32 }
 0x1d4   :  { %v970_v37 = vpop.f32.mrf.mxu2  ;;  %v1099_v21 = vpop.f32.mrf.mxu3 }
 0x1d5   :  { %v971_v50 = vadd.f32 %v2615_v2, %v970_v37 }
 0x1d7   :  { %v1096_v44 = vadd.f32 %v1095_v51, %v971_v50 }
 0x1d9   :  { %1413 = vmatmul.f32.gmra.mxu2 %v2570_v29  ;;  %1502 = vmatmul.f32.gmra.mxu3 %v2578_v7  ;;  %v1195_v61 = vadd.f32 %v1194_v49, %v1096_v44 }
 0x1db   :  { %v2665_v18 = vadd.f32 %v1305_v11, %v1195_v61 }
 0x1dc   :  { %v978_v42 = vpop.f32.mrf.mxu2  ;;  %v1103_v16 = vpop.f32.mrf.mxu3 }
 0x1dd   :  { %v979_v8 = vadd.f32 %v2615_v2, %v978_v42 }
 0x1df   :  { %v2668_v33 = vadd.f32 %v1099_v21, %v979_v8 }
 0x1e1   :  { %1417 = vmatmul.f32.gmra.mxu2 %v2578_v7  ;;  %1506 = vmatmul.f32.gmra.mxu3 %v2586_v27 }
 0x1e4   :  { %v986_v46 = vpop.f32.mrf.mxu2  ;;  %v1107_v39 = vpop.f32.mrf.mxu3 }
 0x1e5   :  { %v987_v29 = vadd.f32 %v2615_v2, %v986_v46 }
 0x1e7   :  { %v2673_v60 = vadd.f32 %v1103_v16, %v987_v29  ;;  %v1311_v16 = vpop.f32.mrf.mxu1 }
 0x1e9   :  { %1421 = vmatmul.f32.gmra.mxu2 %v2586_v27  ;;  %1510 = vmatmul.f32.gmra.mxu3 %v2594_v4 }
 0x1ec   :  { %v994_v10 = vpop.f32.mrf.mxu2  ;;  %v1111_v13 = vpop.f32.mrf.mxu3 }
 0x1ed   :  { %v995_v55 = vadd.f32 %v2615_v2, %v994_v10 }
 0x1ef   :  { %v2678_v17 = vadd.f32 %v1107_v39, %v995_v55  ;;  %v1317_v10 = vpop.f32.mrf.mxu1 }
 0x1f1   :  { %1425 = vmatmul.f32.gmra.mxu2 %v2594_v4  ;;  %1514 = vmatmul.f32.gmra.mxu3 %v2600_v30 }
 0x1f4   :  { %v1002_v7 = vpop.f32.mrf.mxu2  ;;  %v1115_v57 = vpop.f32.mrf.mxu3 }
 0x1f5   :  { %v1003_v31 = vadd.f32 %v2615_v2, %v1002_v7 }
 0x1f7   :  { %v2683_v48 = vadd.f32 %v1111_v13, %v1003_v31  ;;  %v1323_v7 = vpop.f32.mrf.mxu1 }
 0x1f9   :  { %1429 = vmatmul.f32.gmra.mxu2 %v2600_v30  ;;  %1518 = vmatmul.f32.gmra.mxu3 %v2605_v23 }
 0x1fc   :  { %v1010_v27 = vpop.f32.mrf.mxu2  ;;  %v1119_v14 = vpop.f32.mrf.mxu3 }
 0x1fd   :  { %v1011_v1 = vadd.f32 %v2615_v2, %v1010_v27 }
 0x1ff   :  { %v2688_v19 = vadd.f32 %v1115_v57, %v1011_v1 }
 0x201   :  { %1433 = vmatmul.f32.gmra.mxu2 %v2605_v23 }
 0x204   :  { %v1018_v4 = vpop.f32.mrf.mxu2  ;;  %v1459_v0 = vpop.f32.mrf.mxu3 }
 0x205   :  { %v1019_v41 = vadd.f32 %v2615_v2, %v1018_v4 }
 0x207   :  { %v2692_v59 = vadd.f32 %v1119_v14, %v1019_v41 }
 0x20c   :  { %v1374_v58 = vpop.f32.mrf.mxu2  ;;  %v1463_v5 = vpop.f32.mrf.mxu3 }
 0x20d   :  { %v1375_v30 = vadd.f32 %v1374_v58, %v2620_v3 }
 0x20f   :  { %v2695_v63 = vadd.f32 %v1459_v0, %v1375_v30 }
 0x214   :  { %v1378_v38 = vpop.f32.mrf.mxu2  ;;  %v1467_v45 = vpop.f32.mrf.mxu3 }
 0x215   :  { %v1379_v43 = vadd.f32 %v1378_v38, %v2625_v22 }
 0x217   :  { %v2698_v34 = vadd.f32 %v1463_v5, %v1379_v43 }
 0x21c   :  { %v1382_v36 = vpop.f32.mrf.mxu2  ;;  %v1471_v23 = vpop.f32.mrf.mxu3 }
 0x21d   :  { %v1383_v40 = vadd.f32 %v1382_v36, %v2630_v9 }
 0x21f   :  { %v2701_v62 = vadd.f32 %v1467_v45, %v1383_v40 }
 0x224   :  { %v1386_v2 = vpop.f32.mrf.mxu2  ;;  %v1475_v25 = vpop.f32.mrf.mxu3 }
 0x225   :  { %v1387_v26 = vadd.f32 %v1386_v2, %v2635_v6 }
 0x227   :  { %v2704_v15 = vadd.f32 %v1471_v23, %v1387_v26 }
 0x22c   :  { %v1390_v3 = vpop.f32.mrf.mxu2  ;;  %v1479_v20 = vpop.f32.mrf.mxu3 }
 0x22d   :  { %v1391_v51 = vadd.f32 %v1390_v3, %v2640_v12  ;;  %v1199_v12 = vpop.f32.mrf.mxu0 }
 0x22f   :  { %v2707_v28 = vadd.f32 %v1475_v25, %v1391_v51 }
 0x234   :  { %v1394_v22 = vpop.f32.mrf.mxu2  ;;  %v1483_v54 = vpop.f32.mrf.mxu3 }
 0x235   :  { %v1395_v53 = vadd.f32 %v1394_v22, %v2645_v35  ;;  %v1204_v39 = vpop.f32.mrf.mxu0 }
 0x236   :  { %v1205_v36 = vadd.f32 %v1204_v39, %v2673_v60 }
 0x237   :  { %v2710_v47 = vadd.f32 %v1479_v20, %v1395_v53 }
 0x238   :  { %v1318_v20 = vadd.f32 %v1317_v10, %v1205_v36 }
 0x23c   :  { %v1398_v9 = vpop.f32.mrf.mxu2  ;;  %v1487_v32 = vpop.f32.mrf.mxu3 }
 0x23d   :  { %v1399_v37 = vadd.f32 %v1398_v9, %v2650_v52  ;;  %v1209_v55 = vpop.f32.mrf.mxu0 }
 0x23e   :  { %v1210_v5 = vadd.f32 %v1209_v55, %v2678_v17 }
 0x23f   :  { %v2713_v21 = vadd.f32 %v1483_v54, %v1399_v37 }
 0x240   :  { %v1324_v25 = vadd.f32 %v1323_v7, %v1210_v5 }
 0x244   :  { %v1402_v6 = vpop.f32.mrf.mxu2  ;;  %v1491_v50 = vpop.f32.mrf.mxu3 }
 0x245   :  { %v1403_v44 = vadd.f32 %v1402_v6, %v2655_v56  ;;  %v1214_v27 = vpop.f32.mrf.mxu0 }
 0x246   :  { %v1215_v41 = vadd.f32 %v1214_v27, %v2683_v48  ;;  %v1200_v48 = vadd.f32 %v1199_v12, %v2668_v33 }
 0x247   :  { %v2716_v49 = vadd.f32 %v1487_v32, %v1403_v44 }
 0x248   :  { %v1312_v9 = vadd.f32 %v1311_v16, %v1200_v48 }
 0x24c   :  { %v1406_v61 = vpop.f32.mrf.mxu2  ;;  %v1495_v11 = vpop.f32.mrf.mxu3 }
 0x24d   :  { %v1407_v42 = vadd.f32 %v1406_v61, %v2660_v24  ;;  %v1329_v24 = vpop.f32.mrf.mxu1  ;;  %v1219_v4 = vpop.f32.mrf.mxu0 }
 0x24e   :  { %v1330_v30 = vadd.f32 %v1329_v24, %v1215_v41 }
 0x24f   :  { %v2719_v35 = vadd.f32 %v1491_v50, %v1407_v42 }
 0x254   :  { %v1410_v8 = vpop.f32.mrf.mxu2  ;;  %v1499_v46 = vpop.f32.mrf.mxu3 }
 0x255   :  { %v1411_v52 = vadd.f32 %v1410_v8, %v2665_v18  ;;  %v1220_v18 = vadd.f32 %v1219_v4, %v2688_v19  ;;  %v1335_v58 = vpop.f32.mrf.mxu1  ;;  %v1224_v2 = vpop.f32.mrf.mxu0 }
 0x256   :  { %v1225_v3 = vadd.f32 %v1224_v2, %v2692_v59 }
 0x257   :  { %v2722_v29 = vadd.f32 %v1495_v11, %v1411_v52  ;;  %v1336_v38 = vadd.f32 %v1335_v58, %v1220_v18 }
 0x259   :  { %v1531_v4 = vmax.f32 %v2722_v29, 0.0  ;;  %v1530_v29 = vmax.f32 %v2719_v35, 0.0  ;;  %v1529_v35 = vmax.f32 %v2716_v49, 0.0  ;;  %v1528_v49 = vmax.f32 %v2713_v21, 0.0 }
 0x25a   :  { %v1527_v21 = vmax.f32 %v2710_v47, 0.0  ;;  %v1526_v47 = vmax.f32 %v2707_v28, 0.0  ;;  %v1525_v28 = vmax.f32 %v2704_v15, 0.0  ;;  %v1524_v15 = vmax.f32 %v2701_v62, 0.0 }
 0x25b   :  { %v1573_v2 = vsel %vm1544_vm3, %v1530_v29, 0  ;;  %v1523_v62 = vmax.f32 %v2698_v34, 0.0  ;;  %v1522_v34 = vmax.f32 %v2695_v63, 0.0 }
 0x25c   :  { %v1414_v13 = vpop.f32.mrf.mxu2  ;;  %v1503_v56 = vpop.f32.mrf.mxu3  ;;  %v1555_v29 = vsel %vm1544_vm3, %v1524_v15, 0 }
 0x25d   :  { %v1341_v17 = vpop.f32.mrf.mxu1  ;;  %v1415_v61 = vadd.f32 %v1414_v13, %v1312_v9  ;;  %v1567_v9 = vsel %vm1544_vm3, %v1528_v49, 0  ;;  %v1549_v63 = vsel %vm1544_vm3, %v1522_v34, 0 }
 0x25e   :  { %v1342_v53 = vadd.f32 %v1341_v17, %v1225_v3 }
 0x25f   :  { %v1500_v52 = vadd.f32 %v1499_v46, %v1415_v61  ;;  %v2833_v61 = vand.u32 4294901760, %v1567_v9 }
 0x261   :  { %v1532_v46 = vmax.f32 %v1500_v52, 0.0 }
 0x264   :  { %v1418_v57 = vpop.f32.mrf.mxu2  ;;  %v1507_v31 = vpop.f32.mrf.mxu3 }
 0x265   :  { %v1419_v54 = vadd.f32 %v1418_v57, %v1318_v20 }
 0x267   :  { %v1504_v59 = vadd.f32 %v1503_v56, %v1419_v54 }
 0x269   :  { %v1533_v39 = vmax.f32 %v1504_v59, 0.0 }
 0x26b   :  { %v1582_v57 = vsel %vm1544_vm3, %v1533_v39, 0 }
 0x26c   :  { %v1422_v14 = vpop.f32.mrf.mxu2  ;;  %v1511_v1 = vpop.f32.mrf.mxu3  ;;  %v2764_v41 = vand.u32 4294901760, %v1582_v57 }
 0x26d   :  { %v1423_v19 = vadd.f32 %v1422_v14, %v1324_v25 }
 0x26f   :  { %v1508_v60 = vadd.f32 %v1507_v31, %v1423_v19  ;;  %v1570_v19 = vsel %vm1544_vm3, %v1529_v35, 0 }
 0x271   :  { %v1534_v12 = vmax.f32 %v1508_v60, 0.0 }
 0x273   :  { %v1585_v13 = vsel %vm1544_vm3, %v1534_v12, 0 }
 0x274   :  { %v1426_v0 = vpop.f32.mrf.mxu2  ;;  %v1515_v45 = vpop.f32.mrf.mxu3  ;;  %v2749_v31 = vand.u32 4294901760, %v1585_v13 }
 0x275   :  { %v1427_v23 = vadd.f32 %v1426_v0, %v1330_v30  ;;  %v1579_v0 = vsel %vm1544_vm3, %v1532_v46, 0 }
 0x276   :  { %v2771_v5 = vsub.f32 %v1585_v13, %v2749_v31  ;;  %v2855_v13 = vsub.f32 %v1567_v9, %v2833_v61 }
 0x277   :  { %v1512_v51 = vadd.f32 %v1511_v1, %v1427_v23  ;;  %v2785_v23 = vsub.f32 %v1582_v57, %v2764_v41  ;;  %v1558_v57 = vsel %vm1544_vm3, %v1525_v28, 0 }
 0x279   :  { %v1535_v37 = vmax.f32 %v1512_v51, 0.0  ;;  %v1663_v20 = vand.u32 4294901760, %v2785_v23  ;;  %v2805_v51 = vand.u32 4294901760, %v1573_v2 }
 0x27b   :  { %v1588_v42 = vsel %vm1544_vm3, %v1535_v37, 0  ;;  %v1664_v17 = vsub.f32 %v2785_v23, %v1663_v20 }
 0x27c   :  { %v1430_v43 = vpop.f32.mrf.mxu2  ;;  %v1519_v44 = vpop.f32.mrf.mxu3  ;;  %v2735_v10 = vand.u32 4294901760, %v1588_v42 }
 0x27d   :  { %v1431_v40 = vadd.f32 %v1430_v43, %v1336_v38  ;;  %v1576_v38 = vsel %vm1544_vm3, %v1531_v4, 0  ;;  %v1665_v60 = vand.u32 4294901760, %v1664_v17 }
 0x27e   :  { %v2754_v14 = vsub.f32 %v1588_v42, %v2735_v10  ;;  %v2791_v25 = vand.u32 4294901760, %v1576_v38 }
 0x27f   :  { %v1516_v26 = vadd.f32 %v1515_v45, %v1431_v40  ;;  %v2777_v45 = vand.u32 4294901760, %v1579_v0  ;;  %v1657_v40 = vand.u32 4294901760, %v2771_v5 }
 0x280   :  { %v1651_v30 = vand.u32 4294901760, %v2754_v14  ;;  %v2813_v54 = vsub.f32 %v1576_v38, %v2791_v25  ;;  %v2875_v38 = vand.u32 4294901760, %v1558_v57 }
 0x281   :  { %v1536_v22 = vmax.f32 %v1516_v26, 0.0  ;;  %v1658_v3 = vsub.f32 %v2771_v5, %v1657_v40  ;;  %v2799_v48 = vsub.f32 %v1579_v0, %v2777_v45 }
 0x282   :  { %v1652_v36 = vsub.f32 %v2754_v14, %v1651_v30 }
 0x283   :  { %v1591_v6 = vsel %vm1544_vm3, %v1536_v22, 0  ;;  %v1659_v22 = vand.u32 4294901760, %v1658_v3  ;;  %v2889_v3 = vand.u32 4294901760, %v1555_v29 }
 0x284   :  { %v1434_v32 = vpop.f32.mrf.mxu2  ;;  %v2731_v33 = vand.u32 4294901760, %v1591_v6  ;;  %v1653_v26 = vand.u32 4294901760, %v1652_v36 }
 0x285   :  { %v1435_v50 = vadd.f32 %v1434_v32, %v1342_v53  ;;  %v1669_v53 = vand.u32 4294901760, %v2799_v48  ;;  %v2819_v32 = vand.u32 4294901760, %v1570_v19 }
 0x286   :  { %v2740_v7 = vsub.f32 %v1591_v6, %v2731_v33  ;;  %v2827_v6 = vsub.f32 %v1573_v2, %v2805_v51 }
 0x287   :  { %v1520_v11 = vadd.f32 %v1519_v44, %v1435_v50  ;;  %v1670_v37 = vsub.f32 %v2799_v48, %v1669_v53  ;;  %v1675_v50 = vand.u32 4294901760, %v2813_v54  ;;  %v1564_v44 = vsel %vm1544_vm3, %v1527_v21, 0 }
 0x288   :  { %v1645_v24 = vand.u32 4294901760, %v2740_v7  ;;  %v2841_v12 = vsub.f32 %v1570_v19, %v2819_v32  ;;  %v1681_v42 = vand.u32 4294901760, %v2827_v6  ;;  %v2847_v52 = vand.u32 4294901760, %v1564_v44 }
 0x289   :  { %v1537_v8 = vmax.f32 %v1520_v11, 0.0  ;;  %v1671_v59 = vand.u32 4294901760, %v1670_v37  ;;  %v1676_v11 = vsub.f32 %v2813_v54, %v1675_v50  ;;  %v2910_v37 = vsub.f32 %v1555_v29, %v2889_v3 }
 0x28a   :  { %v1646_v58 = vsub.f32 %v2740_v7, %v1645_v24  ;;  %v1687_v46 = vand.u32 4294901760, %v2841_v12 }
 0x28b   :  { %v1594_v16 = vsel %vm1544_vm3, %v1537_v8, 0  ;;  %v1561_v8 = vsel %vm1544_vm3, %v1526_v47, 0  ;;  %v1677_v39 = vand.u32 4294901760, %v1676_v11 }
 0x28c   :  { %v2737_v55 = vand.u32 4294901760, %v1594_v16  ;;  %v1647_v43 = vand.u32 4294901760, %v1646_v58  ;;  %v1688_v0 = vsub.f32 %v2841_v12, %v1687_v46  ;;  %v1693_v58 = vand.u32 4294901760, %v2855_v13 }
 0x28e   :  { %v2744_v56 = vsub.f32 %v1594_v16, %v2737_v55  ;;  %1597 = vmatpush.xpose.msrb.mxu0 %v2737_v55  ;;  %1793 = vmatpush.xpose.msra.mxu3 %v2737_v55  ;;  %v1682_v16 = vsub.f32 %v2827_v6, %v1681_v42  ;;  %v1694_v36 = vsub.f32 %v2855_v13, %v1693_v58 }
 0x290   :  { %1740 = vmatpush.xpose.msra.mxu2 %v2744_v56  ;;  %v1639_v27 = vand.u32 4294901760, %v2744_v56  ;;  %v1683_v4 = vand.u32 4294901760, %v1682_v16  ;;  %v1695_v49 = vand.u32 4294901760, %v1694_v36 }
 0x292   :  { %1599 = vmatpush.xpose.msrb.mxu0 %v2731_v33  ;;  %1795 = vmatpush.xpose.msra.mxu3 %v2731_v33  ;;  %v1640_v1 = vsub.f32 %v2744_v56, %v1639_v27 }
 0x294   :  { %1743 = vmatpush.xpose.msra.mxu2 %v2740_v7  ;;  %v1641_v18 = vand.u32 4294901760, %v1640_v1  ;;  %v2861_v1 = vand.u32 4294901760, %v1561_v8  ;;  %v41_v7 = vld [vmem:[%s3003_s5] sm:$0x1] }
 0x295   :  { %v1546_v56 = vsel %vm1544_vm3, %v41_v7, 0 }
 0x296   :  { %1601 = vmatpush.xpose.msrb.mxu0 %v2735_v10  ;;  %1642 = vmatpush.xpose.msrb.mxu1 %v1641_v18  ;;  %v2869_v18 = vsub.f32 %v1564_v44, %v2847_v52  ;;  %v2883_v35 = vsub.f32 %v1561_v8, %v2861_v1  ;;  %v2914_v44 = vand.u32 4294901760, %v1549_v63  ;;  %v1717_v8 = vand.u32 4294901760, %v2910_v37 }
 0x297   :  { %1797 = vmatpush.xpose.msra.mxu3 %v2735_v10 }
 0x298   :  { %1746 = vmatpush.xpose.msra.mxu2 %v2754_v14  ;;  %v1699_v2 = vand.u32 4294901760, %v2869_v18  ;;  %v1705_v17 = vand.u32 4294901760, %v2883_v35  ;;  %v1718_v16 = vsub.f32 %v2910_v37, %v1717_v8  ;;  %v2932_v15 = vsub.f32 %v1549_v63, %v2914_v44 }
 0x29a   :  { %1603 = vmatpush.xpose.msrb.mxu0 %v2749_v31  ;;  %1648 = vmatpush.xpose.msrb.mxu1 %v1647_v43  ;;  %v1689_v43 = vand.u32 4294901760, %v1688_v0  ;;  %v1700_v19 = vsub.f32 %v2869_v18, %v1699_v2 }
 0x29b   :  { %1799 = vmatpush.xpose.msra.mxu3 %v2749_v31 }
 0x29c   :  { %1749 = vmatpush.xpose.msra.mxu2 %v2771_v5  ;;  %v1701_v9 = vand.u32 4294901760, %v1700_v19 }
 0x29e   :  { %1605 = vmatpush.xpose.msrb.mxu0 %v2764_v41  ;;  %1654 = vmatpush.xpose.msrb.mxu1 %v1653_v26  ;;  %v1552_v26 = vsel %vm1544_vm3, %v1523_v62, 0  ;;  %v1729_v62 = vand.u32 4294901760, %v2932_v15 }
 0x29f   :  { %1801 = vmatpush.xpose.msra.mxu3 %v2764_v41  ;;  %v2902_v21 = vand.u32 4294901760, %v1552_v26 }
 0x2a0   :  { %1752 = vmatpush.xpose.msra.mxu2 %v2785_v23 }
 0x2a1   :  { %v2922_v28 = vsub.f32 %v1552_v26, %v2902_v21 }
 0x2a2   :  { %1607 = vmatpush.xpose.msrb.mxu0 %v2777_v45  ;;  %1660 = vmatpush.xpose.msrb.mxu1 %v1659_v22  ;;  %v2897_v22 = vsub.f32 %v1558_v57, %v2875_v38 }
 0x2a3   :  { %1803 = vmatpush.xpose.msra.mxu3 %v2777_v45  ;;  %v1723_v57 = vand.u32 4294901760, %v2922_v28 }
 0x2a4   :  { %1755 = vmatpush.xpose.msra.mxu2 %v2799_v48  ;;  %v1711_v47 = vand.u32 4294901760, %v2897_v22 }
 0x2a5   :  { %v1724_v0 = vsub.f32 %v2922_v28, %v1723_v57 }
 0x2a6   :  { %1609 = vmatpush.xpose.msrb.mxu0 %v2791_v25  ;;  %1666 = vmatpush.xpose.msrb.mxu1 %v1665_v60  ;;  %v1706_v60 = vsub.f32 %v2883_v35, %v1705_v17  ;;  %v1712_v11 = vsub.f32 %v2897_v22, %v1711_v47 }
 0x2a7   :  { %1805 = vmatpush.xpose.msra.mxu3 %v2791_v25  ;;  %v1725_v29 = vand.u32 4294901760, %v1724_v0 }
 0x2a8   :  { %1758 = vmatpush.xpose.msra.mxu2 %v2813_v54 }
 0x2aa   :  { %1611 = vmatpush.xpose.msrb.mxu0 %v2805_v51  ;;  %1672 = vmatpush.xpose.msrb.mxu1 %v1671_v59  ;;  %v1707_v59 = vand.u32 4294901760, %v1706_v60 }
 0x2ab   :  { %1807 = vmatpush.xpose.msra.mxu3 %v2805_v51 }
 0x2ac   :  { %1761 = vmatpush.xpose.msra.mxu2 %v2827_v6 }
 0x2ae   :  { %1613 = vmatpush.xpose.msrb.mxu0 %v2819_v32  ;;  %1678 = vmatpush.xpose.msrb.mxu1 %v1677_v39  ;;  %v1713_v39 = vand.u32 4294901760, %v1712_v11 }
 0x2af   :  { %1809 = vmatpush.xpose.msra.mxu3 %v2819_v32 }
 0x2b0   :  { %1764 = vmatpush.xpose.msra.mxu2 %v2841_v12 }
 0x2b2   :  { %1615 = vmatpush.xpose.msrb.mxu0 %v2833_v61  ;;  %1684 = vmatpush.xpose.msrb.mxu1 %v1683_v4  ;;  %v1719_v4 = vand.u32 4294901760, %v1718_v16 }
 0x2b3   :  { %1811 = vmatpush.xpose.msra.mxu3 %v2833_v61 }
 0x2b4   :  { %1767 = vmatpush.xpose.msra.mxu2 %v2855_v13 }
 0x2b6   :  { %1617 = vmatpush.xpose.msrb.mxu0 %v2847_v52  ;;  %1690 = vmatpush.xpose.msrb.mxu1 %v1689_v43  ;;  %v1730_v43 = vsub.f32 %v2932_v15, %v1729_v62 }
 0x2b7   :  { %1813 = vmatpush.xpose.msra.mxu3 %v2847_v52 }
 0x2b8   :  { %1770 = vmatpush.xpose.msra.mxu2 %v2869_v18  ;;  %v1731_v36 = vand.u32 4294901760, %v1730_v43 }
 0x2ba   :  { %1619 = vmatpush.xpose.msrb.mxu0 %v2861_v1  ;;  %1696 = vmatpush.xpose.msrb.mxu1 %v1695_v49 }
 0x2bb   :  { %1815 = vmatpush.xpose.msra.mxu3 %v2861_v1 }
 0x2bc   :  { %1773 = vmatpush.xpose.msra.mxu2 %v2883_v35 }
 0x2be   :  { %1621 = vmatpush.xpose.msrb.mxu0 %v2875_v38  ;;  %1702 = vmatpush.xpose.msrb.mxu1 %v1701_v9 }
 0x2bf   :  { %1817 = vmatpush.xpose.msra.mxu3 %v2875_v38 }
 0x2c0   :  { %1776 = vmatpush.xpose.msra.mxu2 %v2897_v22 }
 0x2c2   :  { %1623 = vmatpush.xpose.msrb.mxu0 %v2889_v3  ;;  %1708 = vmatpush.xpose.msrb.mxu1 %v1707_v59 }
 0x2c3   :  { %1819 = vmatpush.xpose.msra.mxu3 %v2889_v3 }
 0x2c4   :  { %1779 = vmatpush.xpose.msra.mxu2 %v2910_v37 }
 0x2c6   :  { %1625 = vmatpush.xpose.msrb.mxu0 %v2902_v21  ;;  %1714 = vmatpush.xpose.msrb.mxu1 %v1713_v39 }
 0x2c7   :  { %1821 = vmatpush.xpose.msra.mxu3 %v2902_v21 }
 0x2c8   :  { %1782 = vmatpush.xpose.msra.mxu2 %v2922_v28 }
 0x2ca   :  { %1627 = vmatpush.xpose.msrb.mxu0 %v2914_v44  ;;  %1720 = vmatpush.xpose.msrb.mxu1 %v1719_v4 }
 0x2cb   :  { %1823 = vmatpush.xpose.msra.mxu3 %v2914_v44 }
 0x2cc   :  { %1785 = vmatpush.xpose.msra.mxu2 %v2932_v15 }
 0x2ce   :  { %1834 = vmatpush.xpose.msra.mxu0 %v1639_v27  ;;  %1726 = vmatpush.xpose.msrb.mxu1 %v1725_v29 }
 0x2d2   :  { %1838 = vmatpush.xpose.msra.mxu0 %v1645_v24  ;;  %1732 = vmatpush.xpose.msrb.mxu1 %v1731_v36  ;;  %v1960_v24 = vmov 0  }
 0x2d3   :  { %1957 = vset.pattern.permute.xlu0 %v1960_v24 }
 0x2d6   :  { %1842 = vmatpush.xpose.msra.mxu0 %v1651_v30  ;;  %1901 = vmatpush.xpose.msra.mxu1 %v2737_v55  ;;  %v1628_v55 = vand.u32 4294901760, %v1546_v56 }
 0x2d8   :  { %v1629_v27 = vsub.f32 %v1546_v56, %v1628_v55  ;;  %1734 = vmatmul.f32.vlgmr.msrb.gmra.mxu1 %v1628_v55 }
 0x2da   :  { %1846 = vmatpush.xpose.msra.mxu0 %v1657_v40  ;;  %1903 = vmatpush.xpose.msra.mxu1 %v2731_v33  ;;  %v1630_v33 = vand.u32 4294901760, %v1629_v27 }
 0x2db   :  { %1788 = vmatmul.f32.vlgmr.msra.gmra.mxu2 %v1629_v27 }
 0x2dc   :  { %1827 = vmatmul.f32.vlgmr.msra.gmra.mxu3 %v1630_v33 }
 0x2de   :  { %1850 = vmatpush.xpose.msra.mxu0 %v1663_v20  ;;  %1905 = vmatpush.xpose.msra.mxu1 %v2735_v10  ;;  %v1631_v10 = vsub.f32 %v1629_v27, %v1630_v33 }
 0x2e0   :  { %v1632_v14 = vand.u32 4294901760, %v1631_v10 }
 0x2e2   :  { %1854 = vmatpush.xpose.msra.mxu0 %v1669_v53  ;;  %1907 = vmatpush.xpose.msra.mxu1 %v2749_v31  ;;  %v12_v31 = vstv %s3004_s6 }
 0x2e3   :  { %1633 = vmatmul.f32.vlgmr.msrb.gmra.mxu0 %v1632_v14  ;;  %13 = vst [vmem:[#allocation2] sm:$0x1] %v12_v31 }
 0x2e6   :  { %1858 = vmatpush.xpose.msra.mxu0 %v1675_v50  ;;  %1909 = vmatpush.xpose.msra.mxu1 %v2764_v41 }
 0x2ea   :  { %1862 = vmatpush.xpose.msra.mxu0 %v1681_v42  ;;  %1911 = vmatpush.xpose.msra.mxu1 %v2777_v45  ;;  %v42_v41 = vld [vmem:[#allocation2] sm:$0x1] }
 0x2eb   :  { %1540 = vperm.xlu0 %1957, %v42_v41  }
 0x2ee   :  { %1866 = vmatpush.xpose.msra.mxu0 %v1687_v46  ;;  %1913 = vmatpush.xpose.msra.mxu1 %v2791_v25 }
 0x2f2   :  { %1870 = vmatpush.xpose.msra.mxu0 %v1693_v58  ;;  %1915 = vmatpush.xpose.msra.mxu1 %v2805_v51 }
 0x2f6   :  { %1874 = vmatpush.xpose.msra.mxu0 %v1699_v2  ;;  %1917 = vmatpush.xpose.msra.mxu1 %v2819_v32 }
 0x2fa   :  { %1878 = vmatpush.xpose.msra.mxu0 %v1705_v17  ;;  %1919 = vmatpush.xpose.msra.mxu1 %v2833_v61 }
 0x2fe   :  { %1882 = vmatpush.xpose.msra.mxu0 %v1711_v47  ;;  %1921 = vmatpush.xpose.msra.mxu1 %v2847_v52 }
 0x302   :  { %1886 = vmatpush.xpose.msra.mxu0 %v1717_v8  ;;  %1923 = vmatpush.xpose.msra.mxu1 %v2861_v1 }
 0x306   :  { %1890 = vmatpush.xpose.msra.mxu0 %v1723_v57  ;;  %1925 = vmatpush.xpose.msra.mxu1 %v2875_v38 }
 0x30a   :  { %1894 = vmatpush.xpose.msra.mxu0 %v1729_v62  ;;  %1927 = vmatpush.xpose.msra.mxu1 %v2889_v3 }
 0x30d   :  { %1896 = vmatmul.f32.vlgmr.msra.gmra.mxu0 %v1628_v55 }
 0x30e   :  { %1929 = vmatpush.xpose.msra.mxu1 %v2902_v21 }
 0x312   :  { %1931 = vmatpush.xpose.msra.mxu1 %v2914_v44 }
 0x315   :  { %1933 = vmatmul.f32.vlgmr.msra.gmra.mxu1 %v1628_v55 }
 0x355   :  { %v1735_v40 = vpop.f32.mrf.mxu1 }
 0x35d   :  { %v1541_v5 = vpop.permute.xlu0 %1540 }
 0x35e   :  { %v1543_v30 = vperm.slane %v1541_v5, 0  ;;  %v1789_v48 = vpop.f32.mrf.mxu2 }
 0x35f   :  { %v1828_v51 = vpop.f32.mrf.mxu3 }
 0x360   :  { %v1634_v45 = vpop.f32.mrf.mxu0 }
 0x361   :  { %v1635_v23 = vadd.f32 %v1634_v45, %v1543_v30 }
 0x363   :  { %v1736_v25 = vadd.f32 %v1735_v40, %v1635_v23 }
 0x365   :  { %v1790_v20 = vadd.f32 %v1789_v48, %v1736_v25 }
 0x367   :  { %v1829_v54 = vadd.f32 %v1828_v51, %v1790_v20 }
 0x38a   :  { %v1897_v53 = vpop.f32.mrf.mxu0 }
 0x38b   :  { %v1898_v32 = vadd.f32 %v1897_v53, %v1829_v54 }
 0x392   :  { %v1934_v6 = vpop.f32.mrf.mxu1 }
 0x393   :  { %v1935_v50 = vadd.f32 %v1934_v6, %v1898_v32 }
 0x395   :  { %1937 = vst [vmem:[%s3005_s7] sm:$0x1] %v1935_v50 }

</bundles_post_ra>
